<compile_context>
chip_gen: v5e
topology: v5e:2x2
jax: 0.10.0
libtpu: 0.0.40
codegen_flags: <defaults>
</compile_context>

<pallas_src>
import numpy as np

import jax
import jax.numpy as jnp
from jax.experimental import pallas as pl
from jax.experimental.pallas import tpu as pltpu


CFG = dict(
    fsize_input=16,
    num_channels_encoder=[2, 4, 8],
    num_output_channels=2,
    kernel_sizes=[(2, 3), (2, 3), (2, 3), (2, 3)],
    fstride=2,
    n_gru_layers=1,
    n_gru_groups=2,
)


# -----------------------------------------------------------------------------
# Parameter construction (PyTorch-equivalent layouts)
# -----------------------------------------------------------------------------

def build_crn_params(key, cfg):
    C = cfg["num_channels_encoder"]
    num_dec = C[:0:-1] + [cfg["num_output_channels"]]
    k_enc = cfg["kernel_sizes"][:-len(num_dec) + 1]
    k_dec = cfg["kernel_sizes"][-len(C) + 1:]
    fstride = cfg["fstride"]

    def nrm(k, shape, scale=0.1):
        return scale * jax.random.normal(k, shape, dtype=jnp.float32)

    keys = iter(jax.random.split(key, 128))

    fsize = cfg["fsize_input"]
    fsizes = [fsize]
    encoder, skips = [], []
    for i in range(len(C) - 1):
        kh, kw = k_enc[i]
        encoder.append(dict(W=nrm(next(keys), (C[i + 1], C[i], kh, kw)),
                            b=nrm(next(keys), (C[i + 1],))))
        skips.append(dict(W=nrm(next(keys), (C[i + 1], C[i + 1], 1, 1)),
                          b=nrm(next(keys), (C[i + 1],))))
        fsize = int((fsize - kw) / fstride + 1)
        fsizes.append(fsize)

    recurr = int(fsizes[-1] * C[-1])
    gH = recurr // cfg["n_gru_groups"]
    gru = []
    for _ in range(cfg["n_gru_layers"]):
        layer = []
        for _ in range(cfg["n_gru_groups"]):
            layer.append(dict(weight_ih=nrm(next(keys), (3 * gH, gH)),   # PyTorch [r|z|n]
                              weight_hh=nrm(next(keys), (3 * gH, gH)),
                              bias_ih=nrm(next(keys), (3 * gH,)),
                              bias_hh=nrm(next(keys), (3 * gH,))))
        gru.append(layer)

    decoder = []
    for i in range(len(num_dec) - 1):
        kh, kw = k_dec[i]
        fs = (fsizes[-i - 1] - 1) * fstride + kw
        op = fsizes[-i - 2] - fs
        decoder.append(dict(W=nrm(next(keys), (num_dec[i], num_dec[i + 1], kh, kw)),
                            b=nrm(next(keys), (num_dec[i + 1],)),
                            op=op))

    return dict(encoder=encoder, skips=skips, gru=gru, decoder=decoder,
                fsizes=fsizes, recurr=recurr)


# -----------------------------------------------------------------------------
# Offline weight packing: convs -> per-time-tap feature-space matmuls
# -----------------------------------------------------------------------------

def _conv_to_feature_taps(W, b, fstride, F_in, transposed, out_pad=0):
    """Pack a (transposed) conv into matmul matrices over flattened (chan, freq)
    features.  taps[s] multiplies the input frame delayed by s time steps."""
    if not transposed:
        C_out, C_in, kh, kw = W.shape
        F_out = (F_in - kw) // fstride + 1
        S = np.zeros((kw, F_in, F_out), np.float32)
        for j in range(kw):
            for fo in range(F_out):
                S[j, fo * fstride + j, fo] = 1.0          # out fo reads in f = fo*s + j

        def tap_w(s):                                     # delay s <-> kernel row kh-1-s
            return W[:, :, kh - 1 - s, :]                 # (C_out, C_in, kw)
        eq = "ocj,jfg->cfog"
    else:
        C_in, C_out, kh, kw = W.shape
        F_out = (F_in - 1) * fstride + kw + out_pad
        S = np.zeros((kw, F_in, F_out), np.float32)
        for j in range(kw):
            for f in range(F_in):
                S[j, f, f * fstride + j] = 1.0            # in f writes out fo = f*s + j

        def tap_w(s):                                     # delay s <-> kernel row s
            return W[:, :, s, :]                          # (C_in, C_out, kw)
        eq = "coj,jfg->cfog"

    taps = [jnp.einsum(eq, tap_w(s), S).reshape(C_in * F_in, C_out * F_out)
            for s in range(kh)]
    bvec = jnp.repeat(b, F_out).reshape(1, C_out * F_out)
    return taps, bvec, F_out


def _skip_to_feature_matmul(W, b, F):
    Ws = W[:, :, 0, 0]                                     # (C_out, C_in)
    G = jnp.kron(Ws.T, jnp.eye(F, dtype=jnp.float32))      # (C_in*F, C_out*F)
    bvec = jnp.repeat(b, F).reshape(1, -1)
    return G, bvec


def _pack_grouped_gru_layer(group_params, gH, n_groups):
    """Block-diagonal (over groups), gate-separated GRU weights."""
    H = gH * n_groups

    def blockdiag(mats):
        out = jnp.zeros((H, H), jnp.float32)
        for g, m in enumerate(mats):
            out = out.at[g * gH:(g + 1) * gH, g * gH:(g + 1) * gH].set(m)
        return out

    packed = []
    for kind in ("weight_ih", "weight_hh"):
        for gate in range(3):                              # r, z, n (PyTorch order)
            rows = slice(gate * gH, (gate + 1) * gH)
            packed.append(blockdiag([p[kind][rows, :].T for p in group_params]))
    for kind in ("bias_ih", "bias_hh"):
        for gate in range(3):
            rows = slice(gate * gH, (gate + 1) * gH)
            packed.append(
                jnp.concatenate([p[kind][rows] for p in group_params]).reshape(1, H))
    # order: wih_r, wih_z, wih_n, whh_r, whh_z, whh_n, bih_r, bih_z, bih_n, bhh_r, bhh_z, bhh_n
    return packed


def pack_crn_params(params, cfg):
    fstride = cfg["fstride"]
    n_groups = cfg["n_gru_groups"]
    recurr = params["recurr"]
    gH = recurr // n_groups

    ops = []
    enc_kh, dec_kh = [], []
    F = cfg["fsize_input"]
    for enc_p, skip_p in zip(params["encoder"], params["skips"]):
        taps, bvec, F = _conv_to_feature_taps(enc_p["W"], enc_p["b"], fstride, F,
                                              transposed=False)
        Gs, bs = _skip_to_feature_matmul(skip_p["W"], skip_p["b"], F)
        ops += list(taps) + [bvec, Gs, bs]
        enc_kh.append(len(taps))
    for layer in params["gru"]:
        ops += _pack_grouped_gru_layer(layer, gH, n_groups)
    for dec_p in params["decoder"]:
        taps, bvec, F = _conv_to_feature_taps(dec_p["W"], dec_p["b"], fstride, F,
                                              transposed=True, out_pad=dec_p["op"])
        ops += list(taps) + [bvec]
        dec_kh.append(len(taps))

    c_out = params["decoder"][-1]["W"].shape[1]
    meta = dict(enc_kh=enc_kh, dec_kh=dec_kh, n_gru_layers=len(params["gru"]),
                recurr=recurr, c_out=c_out, f_out=F, d_out=c_out * F)
    return ops, meta


# -----------------------------------------------------------------------------
# The fused Pallas kernel (whole CRN for one batch element per grid step)
# -----------------------------------------------------------------------------

def _make_crn_kernel(meta, T):
    enc_kh = meta["enc_kh"]
    dec_kh = meta["dec_kh"]
    n_gru_layers = meta["n_gru_layers"]
    H = meta["recurr"]

    def fast_sigmoid(v):
        # 1 / (1 + exp(-v)); exp + approximate reciprocal both stay on the EUP slot.
        return pl.reciprocal(1.0 + jnp.exp(-v), approx=True)

    def kernel(*refs):
        it = iter(refs)
        x_ref = next(it)
        enc = []
        for kh in enc_kh:
            taps = [next(it) for _ in range(kh)]
            enc.append((taps, next(it), next(it), next(it)))       # taps, bvec, Gskip, bskip
        gru = [[next(it) for _ in range(12)] for _ in range(n_gru_layers)]
        dec = []
        for kh in dec_kh:
            taps = [next(it) for _ in range(kh)]
            dec.append((taps, next(it)))                           # taps, bvec
        d_ref = next(it)
        xh_ref = next(it)
        gi_r_s = next(it)
        gi_z_s = next(it)
        gi_n_s = next(it)
        h_buf = next(it)

        # (T, T) causal delay matrices, built once (hoisted) and reused by all blocks.
        shift_cache = {}

        def shift_mat(s):
            if s not in shift_cache:
                row = jax.lax.broadcasted_iota(jnp.int32, (T, T), 0)
                col = jax.lax.broadcasted_iota(jnp.int32, (T, T), 1)
                shift_cache[s] = (row - col == s).astype(jnp.float32)
            return shift_cache[s]

        def conv_block(A, taps, bvec_ref, act):
            out = jnp.dot(A, taps[0][...], preferred_element_type=jnp.float32)
            out = out + bvec_ref[...]
            for s in range(1, len(taps)):
                A_s = jnp.dot(shift_mat(s), A, preferred_element_type=jnp.float32)
                out = out + jnp.dot(A_s, taps[s][...],
                                    preferred_element_type=jnp.float32)
            if act == "elu":
                out = jnp.where(out > 0.0, out, jnp.exp(jnp.minimum(out, 0.0)) - 1.0)
            elif act == "sigmoid":
                out = 1.0 / (1.0 + jnp.exp(-out))
            return out

        # ---- encoder + skip 1x1 convs (all VMEM-resident) -------------------
        A = x_ref[0]                                         # (T, C_in * F_in)
        skips = []
        for taps, bvec, g_skip, b_skip in enc:
            A = conv_block(A, taps, bvec, "elu")
            skips.append(jnp.dot(A, g_skip[...],
                                 preferred_element_type=jnp.float32) + b_skip[...])

        # ---- grouped GRU -----------------------------------------------------
        for layer in gru:
            (wih_r, wih_z, wih_n, whh_r, whh_z, whh_n,
             bih_r, bih_z, bih_n, bhh_r, bhh_z, bhh_n) = [r[...] for r in layer]
            # input projections for ALL T steps, hoisted out of the recurrence
            gi_r_s[...] = jnp.dot(A, wih_r, preferred_element_type=jnp.float32) + bih_r
            gi_z_s[...] = jnp.dot(A, wih_z, preferred_element_type=jnp.float32) + bih_z
            gi_n_s[...] = jnp.dot(A, wih_n, preferred_element_type=jnp.float32) + bih_n
            h = jnp.zeros((1, H), jnp.float32)
            for t in range(T):                               # static unroll (T small)
                gh_r = jnp.dot(h, whh_r, preferred_element_type=jnp.float32) + bhh_r
                gh_z = jnp.dot(h, whh_z, preferred_element_type=jnp.float32) + bhh_z
                gh_n = jnp.dot(h, whh_n, preferred_element_type=jnp.float32) + bhh_n
                r = fast_sigmoid(gi_r_s[t:t + 1, :] + gh_r)
                z = fast_sigmoid(gi_z_s[t:t + 1, :] + gh_z)
                n = jnp.tanh(gi_n_s[t:t + 1, :] + r * gh_n)
                h = (1.0 - z) * n + z * h
                h_buf[t:t + 1, :] = h
            A = h_buf[...]
        xh_ref[0] = A

        # ---- decoder with skip connections -----------------------------------
        n_dec = len(dec)
        for i, (taps, bvec) in enumerate(dec):
            A = A + skips[-i - 1]
            A = conv_block(A, taps, bvec, "elu" if i < n_dec - 1 else "sigmoid")
        d_ref[0] = A

    return kernel


def crn_forward(x, packed_ops, meta):
    """x: (B, C_in, T, F_in) NCHW -> (d, x_hidden), matching CRN.forward."""
    B, C_in, T, F_in = x.shape
    D0 = C_in * F_in
    H = meta["recurr"]
    D_out = meta["d_out"]

    # Single layout conversion at the kernel boundary: NCHW -> (B, T, C*F).
    x3 = jnp.transpose(x, (0, 2, 1, 3)).reshape(B, T, D0)

    in_specs = [pl.BlockSpec((1, T, D0), lambda b: (b, 0, 0))]
    in_specs += [pl.BlockSpec(w.shape, lambda b: (0, 0)) for w in packed_ops]
    out_specs = (pl.BlockSpec((1, T, D_out), lambda b: (b, 0, 0)),
                 pl.BlockSpec((1, T, H), lambda b: (b, 0, 0)))
    out_shape = (jax.ShapeDtypeStruct((B, T, D_out), jnp.float32),
                 jax.ShapeDtypeStruct((B, T, H), jnp.float32))

    d3, x_hidden = pl.pallas_call(
        _make_crn_kernel(meta, T),
        grid=(B,),
        in_specs=in_specs,
        out_specs=out_specs,
        out_shape=out_shape,
        scratch_shapes=[pltpu.VMEM((T, H), jnp.float32) for _ in range(4)],
        compiler_params=pltpu.CompilerParams(dimension_semantics=("parallel",)),
    )(x3, *packed_ops)

    d = d3.reshape(B, T, meta["c_out"], meta["f_out"]).transpose(0, 2, 1, 3)
    return d, x_hidden


# -----------------------------------------------------------------------------
# Pure-JAX reference (for numerical validation of the fused kernel)
# -----------------------------------------------------------------------------

def _elu(x):
    return jnp.where(x > 0.0, x, jnp.exp(jnp.minimum(x, 0.0)) - 1.0)


def _ref_causal_conv_block(x, W, b, fstride):
    kh = W.shape[2]
    y = jax.lax.conv_general_dilated(
        x, W, window_strides=(1, fstride),
        padding=((kh - 1, kh - 1), (0, 0)),
        dimension_numbers=("NCHW", "OIHW", "NCHW"))
    y = y + b.reshape(1, -1, 1, 1)
    return y[:, :, :y.shape[2] - (kh - 1), :]


def _ref_conv1x1(x, W, b):
    y = jax.lax.conv_general_dilated(
        x, W, window_strides=(1, 1), padding="VALID",
        dimension_numbers=("NCHW", "OIHW", "NCHW"))
    return y + b.reshape(1, -1, 1, 1)


def _ref_causal_transconv_block(x, Wt, b, fstride, out_pad):
    kh, kw = Wt.shape[2], Wt.shape[3]
    W_eq = jnp.flip(Wt, axis=(2, 3)).transpose(1, 0, 2, 3)      # (C_out, C_in, kh, kw)
    y = jax.lax.conv_general_dilated(
        x, W_eq, window_strides=(1, 1),
        padding=((kh - 1, kh - 1), (kw - 1, kw - 1 + out_pad)),
        lhs_dilation=(1, fstride),
        dimension_numbers=("NCHW", "OIHW", "NCHW"))
    y = y + b.reshape(1, -1, 1, 1)
    return y[:, :, :y.shape[2] - (kh - 1), :]


def _ref_grouped_gru(x, layers, n_groups):
    for layer in layers:
        gH = layer[0]["weight_hh"].shape[1]
        chunks = jnp.split(x, n_groups, axis=-1)
        outs = []
        for xg, p in zip(chunks, layer):
            B, T, _ = xg.shape
            h = jnp.zeros((B, gH), jnp.float32)
            ys = []
            for t in range(T):
                gi = xg[:, t, :] @ p["weight_ih"].T + p["bias_ih"]
                gh = h @ p["weight_hh"].T + p["bias_hh"]
                r = jax.nn.sigmoid(gi[:, :gH] + gh[:, :gH])
                z = jax.nn.sigmoid(gi[:, gH:2 * gH] + gh[:, gH:2 * gH])
                n = jnp.tanh(gi[:, 2 * gH:] + r * gh[:, 2 * gH:])
                h = (1.0 - z) * n + z * h
                ys.append(h)
            outs.append(jnp.stack(ys, axis=1))
        x = jnp.concatenate(outs, axis=-1)
    return x


def crn_forward_reference(x, params, cfg):
    fstride = cfg["fstride"]
    skips = []
    cur = x
    for enc_p, skip_p in zip(params["encoder"], params["skips"]):
        cur = _elu(_ref_causal_conv_block(cur, enc_p["W"], enc_p["b"], fstride))
        skips.append(_ref_conv1x1(cur, skip_p["W"], skip_p["b"]))
    B, C, T, F = cur.shape
    g_in = cur.transpose(0, 2, 1, 3).reshape(B, T, C * F)
    x_hidden = _ref_grouped_gru(g_in, params["gru"], cfg["n_gru_groups"])
    d = x_hidden.reshape(B, T, C, F).transpose(0, 2, 1, 3)
    n_dec = len(params["decoder"])
    for i, dec_p in enumerate(params["decoder"]):
        d = d + skips[-i - 1]
        d = _ref_causal_transconv_block(d, dec_p["W"], dec_p["b"], fstride, dec_p["op"])
        d = _elu(d) if i < n_dec - 1 else jax.nn.sigmoid(d)
    return d, x_hidden


# -----------------------------------------------------------------------------

if __name__ == "__main__":
    key = jax.random.PRNGKey(0)
    pkey, xkey = jax.random.split(key)

    params = build_crn_params(pkey, CFG)
    packed_ops, meta = pack_crn_params(params, CFG)

    B, T = 2, 8
    x = jax.random.normal(
        xkey, (B, CFG["num_channels_encoder"][0], T, CFG["fsize_input"]),
        dtype=jnp.float32)

    fwd = jax.jit(lambda inp, ops: crn_forward(inp, ops, meta))
    d, x_hidden = fwd(x, packed_ops)
    d = jax.block_until_ready(d)
    x_hidden = jax.block_until_ready(x_hidden)

    assert d.shape == (B, CFG["num_output_channels"], T, CFG["fsize_input"]), d.shape
    assert x_hidden.shape == (B, T, meta["recurr"]), x_hidden.shape
    assert bool(jnp.all(jnp.isfinite(d))) and bool(jnp.all(jnp.isfinite(x_hidden)))
    # output nonlinearity is Sigmoid -> mask in (0, 1)
    assert bool(jnp.all(d >= 0.0)) and bool(jnp.all(d <= 1.0))

    # numerical check against a pure-JAX reference (catches packing/layout bugs;
    # tolerance accounts for the approximate-reciprocal GRU gates)
    d_want, xh_want = jax.jit(lambda inp: crn_forward_reference(inp, params, CFG))(x)
    err_d = float(jnp.max(jnp.abs(d - d_want)))
    err_h = float(jnp.max(jnp.abs(x_hidden - xh_want)))
    assert err_d < 1e-2 and err_h < 1e-2, (err_d, err_h)

    print("KERNEL_OK")
</pallas_src>

<mosaic_0001>
module attributes {stable_mosaic.version = 11 : i64} {
  func.func @kernel(%arg0: i32, %arg1: memref<1x8x32xf32, #tpu.memory_space<vmem>>, %arg2: memref<32x28xf32, #tpu.memory_space<vmem>>, %arg3: memref<32x28xf32, #tpu.memory_space<vmem>>, %arg4: memref<1x28xf32, #tpu.memory_space<vmem>>, %arg5: memref<28x28xf32, #tpu.memory_space<vmem>>, %arg6: memref<1x28xf32, #tpu.memory_space<vmem>>, %arg7: memref<28x24xf32, #tpu.memory_space<vmem>>, %arg8: memref<28x24xf32, #tpu.memory_space<vmem>>, %arg9: memref<1x24xf32, #tpu.memory_space<vmem>>, %arg10: memref<24x24xf32, #tpu.memory_space<vmem>>, %arg11: memref<1x24xf32, #tpu.memory_space<vmem>>, %arg12: memref<24x24xf32, #tpu.memory_space<vmem>>, %arg13: memref<24x24xf32, #tpu.memory_space<vmem>>, %arg14: memref<24x24xf32, #tpu.memory_space<vmem>>, %arg15: memref<24x24xf32, #tpu.memory_space<vmem>>, %arg16: memref<24x24xf32, #tpu.memory_space<vmem>>, %arg17: memref<24x24xf32, #tpu.memory_space<vmem>>, %arg18: memref<1x24xf32, #tpu.memory_space<vmem>>, %arg19: memref<1x24xf32, #tpu.memory_space<vmem>>, %arg20: memref<1x24xf32, #tpu.memory_space<vmem>>, %arg21: memref<1x24xf32, #tpu.memory_space<vmem>>, %arg22: memref<1x24xf32, #tpu.memory_space<vmem>>, %arg23: memref<1x24xf32, #tpu.memory_space<vmem>>, %arg24: memref<24x28xf32, #tpu.memory_space<vmem>>, %arg25: memref<24x28xf32, #tpu.memory_space<vmem>>, %arg26: memref<1x28xf32, #tpu.memory_space<vmem>>, %arg27: memref<28x32xf32, #tpu.memory_space<vmem>>, %arg28: memref<28x32xf32, #tpu.memory_space<vmem>>, %arg29: memref<1x32xf32, #tpu.memory_space<vmem>>, %arg30: memref<1x8x32xf32, #tpu.memory_space<vmem>>, %arg31: memref<1x8x24xf32, #tpu.memory_space<vmem>>, %arg32: memref<8x24xf32, #tpu.memory_space<vmem>>, %arg33: memref<8x24xf32, #tpu.memory_space<vmem>>, %arg34: memref<8x24xf32, #tpu.memory_space<vmem>>, %arg35: memref<8x24xf32, #tpu.memory_space<vmem>>) attributes {dimension_semantics = [#tpu.dimension_semantics<parallel>], iteration_bounds = array<i64: 2>, scalar_prefetch = 0 : i64, scratch_operands = 4 : i64, tpu.core_type = #tpu.core_type<tc>, window_params = [{transform_indices = @transform_0, window_bounds = array<i64: 1, 8, 32>}, {pipeline_mode = #tpu.pipeline_mode<synchronous>, transform_indices = @transform_1, window_bounds = array<i64: 32, 28>}, {pipeline_mode = #tpu.pipeline_mode<synchronous>, transform_indices = @transform_2, window_bounds = array<i64: 32, 28>}, {pipeline_mode = #tpu.pipeline_mode<synchronous>, transform_indices = @transform_3, window_bounds = array<i64: 1, 28>}, {pipeline_mode = #tpu.pipeline_mode<synchronous>, transform_indices = @transform_4, window_bounds = array<i64: 28, 28>}, {pipeline_mode = #tpu.pipeline_mode<synchronous>, transform_indices = @transform_5, window_bounds = array<i64: 1, 28>}, {pipeline_mode = #tpu.pipeline_mode<synchronous>, transform_indices = @transform_6, window_bounds = array<i64: 28, 24>}, {pipeline_mode = #tpu.pipeline_mode<synchronous>, transform_indices = @transform_7, window_bounds = array<i64: 28, 24>}, {pipeline_mode = #tpu.pipeline_mode<synchronous>, transform_indices = @transform_8, window_bounds = array<i64: 1, 24>}, {pipeline_mode = #tpu.pipeline_mode<synchronous>, transform_indices = @transform_9, window_bounds = array<i64: 24, 24>}, {pipeline_mode = #tpu.pipeline_mode<synchronous>, transform_indices = @transform_10, window_bounds = array<i64: 1, 24>}, {pipeline_mode = #tpu.pipeline_mode<synchronous>, transform_indices = @transform_11, window_bounds = array<i64: 24, 24>}, {pipeline_mode = #tpu.pipeline_mode<synchronous>, transform_indices = @transform_12, window_bounds = array<i64: 24, 24>}, {pipeline_mode = #tpu.pipeline_mode<synchronous>, transform_indices = @transform_13, window_bounds = array<i64: 24, 24>}, {pipeline_mode = #tpu.pipeline_mode<synchronous>, transform_indices = @transform_14, window_bounds = array<i64: 24, 24>}, {pipeline_mode = #tpu.pipeline_mode<synchronous>, transform_indices = @transform_15, window_bounds = array<i64: 24, 24>}, {pipeline_mode = #tpu.pipeline_mode<synchronous>, transform_indices = @transform_16, window_bounds = array<i64: 24, 24>}, {pipeline_mode = #tpu.pipeline_mode<synchronous>, transform_indices = @transform_17, window_bounds = array<i64: 1, 24>}, {pipeline_mode = #tpu.pipeline_mode<synchronous>, transform_indices = @transform_18, window_bounds = array<i64: 1, 24>}, {pipeline_mode = #tpu.pipeline_mode<synchronous>, transform_indices = @transform_19, window_bounds = array<i64: 1, 24>}, {pipeline_mode = #tpu.pipeline_mode<synchronous>, transform_indices = @transform_20, window_bounds = array<i64: 1, 24>}, {pipeline_mode = #tpu.pipeline_mode<synchronous>, transform_indices = @transform_21, window_bounds = array<i64: 1, 24>}, {pipeline_mode = #tpu.pipeline_mode<synchronous>, transform_indices = @transform_22, window_bounds = array<i64: 1, 24>}, {pipeline_mode = #tpu.pipeline_mode<synchronous>, transform_indices = @transform_23, window_bounds = array<i64: 24, 28>}, {pipeline_mode = #tpu.pipeline_mode<synchronous>, transform_indices = @transform_24, window_bounds = array<i64: 24, 28>}, {pipeline_mode = #tpu.pipeline_mode<synchronous>, transform_indices = @transform_25, window_bounds = array<i64: 1, 28>}, {pipeline_mode = #tpu.pipeline_mode<synchronous>, transform_indices = @transform_26, window_bounds = array<i64: 28, 32>}, {pipeline_mode = #tpu.pipeline_mode<synchronous>, transform_indices = @transform_27, window_bounds = array<i64: 28, 32>}, {pipeline_mode = #tpu.pipeline_mode<synchronous>, transform_indices = @transform_28, window_bounds = array<i64: 1, 32>}, {transform_indices = @transform_29, window_bounds = array<i64: 1, 8, 32>}, {transform_indices = @transform_30, window_bounds = array<i64: 1, 8, 24>}]} {
    %c0 = arith.constant 0 : index
    %c0_0 = arith.constant 0 : index
    %c0_1 = arith.constant 0 : index
    %0 = vector.load %arg1[%c0, %c0_0, %c0_1] : memref<1x8x32xf32, #tpu.memory_space<vmem>>, vector<1x8x32xf32>
    %1 = vector.shape_cast %0 : vector<1x8x32xf32> to vector<8x32xf32>
    %c0_2 = arith.constant 0 : index
    %c0_3 = arith.constant 0 : index
    %2 = vector.load %arg2[%c0_2, %c0_3] : memref<32x28xf32, #tpu.memory_space<vmem>>, vector<32x28xf32>
    %cst = arith.constant dense<0.000000e+00> : vector<8x28xf32>
    %3 = tpu.matmul %1, %2, %cst {dimension_numbers = #tpu.dot_dimension_numbers<[1], [0], [0], [1], [0, 0, 1, 1], [], []>} : vector<8x32xf32>, vector<32x28xf32>, vector<8x28xf32> -> vector<8x28xf32>
    %c0_4 = arith.constant 0 : index
    %c0_5 = arith.constant 0 : index
    %4 = vector.load %arg4[%c0_4, %c0_5] : memref<1x28xf32, #tpu.memory_space<vmem>>, vector<1x28xf32>
    %5 = vector.broadcast %4 : vector<1x28xf32> to vector<8x28xf32>
    %6 = arith.addf %3, %5 : vector<8x28xf32>
    %7 = tpu.iota {dimensions = array<i32: 0>} : vector<8x8xi32>
    %8 = tpu.iota {dimensions = array<i32: 1>} : vector<8x8xi32>
    %9 = arith.subi %7, %8 : vector<8x8xi32>
    %c1_i32 = arith.constant 1 : i32
    %10 = vector.broadcast %c1_i32 : i32 to vector<8x8xi32>
    %11 = arith.cmpi eq, %9, %10 : vector<8x8xi32>
    %12 = arith.extui %11 : vector<8x8xi1> to vector<8x8xi32>
    %13 = arith.sitofp %12 : vector<8x8xi32> to vector<8x8xf32>
    %cst_6 = arith.constant dense<0.000000e+00> : vector<8x32xf32>
    %14 = tpu.matmul %13, %1, %cst_6 {dimension_numbers = #tpu.dot_dimension_numbers<[1], [0], [0], [1], [0, 0, 1, 1], [], []>} : vector<8x8xf32>, vector<8x32xf32>, vector<8x32xf32> -> vector<8x32xf32>
    %c0_7 = arith.constant 0 : index
    %c0_8 = arith.constant 0 : index
    %15 = vector.load %arg3[%c0_7, %c0_8] : memref<32x28xf32, #tpu.memory_space<vmem>>, vector<32x28xf32>
    %cst_9 = arith.constant dense<0.000000e+00> : vector<8x28xf32>
    %16 = tpu.matmul %14, %15, %cst_9 {dimension_numbers = #tpu.dot_dimension_numbers<[1], [0], [0], [1], [0, 0, 1, 1], [], []>} : vector<8x32xf32>, vector<32x28xf32>, vector<8x28xf32> -> vector<8x28xf32>
    %17 = arith.addf %6, %16 : vector<8x28xf32>
    %cst_10 = arith.constant 0.000000e+00 : f32
    %18 = vector.broadcast %cst_10 : f32 to vector<8x28xf32>
    %19 = arith.cmpf ogt, %17, %18 : vector<8x28xf32>
    %cst_11 = arith.constant 0.000000e+00 : f32
    %20 = vector.broadcast %cst_11 : f32 to vector<8x28xf32>
    %21 = arith.minimumf %17, %20 : vector<8x28xf32>
    %22 = math.exp %21 : vector<8x28xf32>
    %cst_12 = arith.constant 1.000000e+00 : f32
    %23 = vector.broadcast %cst_12 : f32 to vector<8x28xf32>
    %24 = arith.subf %22, %23 : vector<8x28xf32>
    %25 = arith.select %19, %17, %24 : vector<8x28xi1>, vector<8x28xf32>
    %c0_13 = arith.constant 0 : index
    %c0_14 = arith.constant 0 : index
    %26 = vector.load %arg5[%c0_13, %c0_14] : memref<28x28xf32, #tpu.memory_space<vmem>>, vector<28x28xf32>
    %cst_15 = arith.constant dense<0.000000e+00> : vector<8x28xf32>
    %27 = tpu.matmul %25, %26, %cst_15 {dimension_numbers = #tpu.dot_dimension_numbers<[1], [0], [0], [1], [0, 0, 1, 1], [], []>} : vector<8x28xf32>, vector<28x28xf32>, vector<8x28xf32> -> vector<8x28xf32>
    %c0_16 = arith.constant 0 : index
    %c0_17 = arith.constant 0 : index
    %28 = vector.load %arg6[%c0_16, %c0_17] : memref<1x28xf32, #tpu.memory_space<vmem>>, vector<1x28xf32>
    %29 = vector.broadcast %28 : vector<1x28xf32> to vector<8x28xf32>
    %30 = arith.addf %27, %29 : vector<8x28xf32>
    %c0_18 = arith.constant 0 : index
    %c0_19 = arith.constant 0 : index
    %31 = vector.load %arg7[%c0_18, %c0_19] : memref<28x24xf32, #tpu.memory_space<vmem>>, vector<28x24xf32>
    %cst_20 = arith.constant dense<0.000000e+00> : vector<8x24xf32>
    %32 = tpu.matmul %25, %31, %cst_20 {dimension_numbers = #tpu.dot_dimension_numbers<[1], [0], [0], [1], [0, 0, 1, 1], [], []>} : vector<8x28xf32>, vector<28x24xf32>, vector<8x24xf32> -> vector<8x24xf32>
    %c0_21 = arith.constant 0 : index
    %c0_22 = arith.constant 0 : index
    %33 = vector.load %arg9[%c0_21, %c0_22] : memref<1x24xf32, #tpu.memory_space<vmem>>, vector<1x24xf32>
    %34 = vector.broadcast %33 : vector<1x24xf32> to vector<8x24xf32>
    %35 = arith.addf %32, %34 : vector<8x24xf32>
    %cst_23 = arith.constant dense<0.000000e+00> : vector<8x28xf32>
    %36 = tpu.matmul %13, %25, %cst_23 {dimension_numbers = #tpu.dot_dimension_numbers<[1], [0], [0], [1], [0, 0, 1, 1], [], []>} : vector<8x8xf32>, vector<8x28xf32>, vector<8x28xf32> -> vector<8x28xf32>
    %c0_24 = arith.constant 0 : index
    %c0_25 = arith.constant 0 : index
    %37 = vector.load %arg8[%c0_24, %c0_25] : memref<28x24xf32, #tpu.memory_space<vmem>>, vector<28x24xf32>
    %cst_26 = arith.constant dense<0.000000e+00> : vector<8x24xf32>
    %38 = tpu.matmul %36, %37, %cst_26 {dimension_numbers = #tpu.dot_dimension_numbers<[1], [0], [0], [1], [0, 0, 1, 1], [], []>} : vector<8x28xf32>, vector<28x24xf32>, vector<8x24xf32> -> vector<8x24xf32>
    %39 = arith.addf %35, %38 : vector<8x24xf32>
    %cst_27 = arith.constant 0.000000e+00 : f32
    %40 = vector.broadcast %cst_27 : f32 to vector<8x24xf32>
    %41 = arith.cmpf ogt, %39, %40 : vector<8x24xf32>
    %cst_28 = arith.constant 0.000000e+00 : f32
    %42 = vector.broadcast %cst_28 : f32 to vector<8x24xf32>
    %43 = arith.minimumf %39, %42 : vector<8x24xf32>
    %44 = math.exp %43 : vector<8x24xf32>
    %cst_29 = arith.constant 1.000000e+00 : f32
    %45 = vector.broadcast %cst_29 : f32 to vector<8x24xf32>
    %46 = arith.subf %44, %45 : vector<8x24xf32>
    %47 = arith.select %41, %39, %46 : vector<8x24xi1>, vector<8x24xf32>
    %c0_30 = arith.constant 0 : index
    %c0_31 = arith.constant 0 : index
    %48 = vector.load %arg10[%c0_30, %c0_31] : memref<24x24xf32, #tpu.memory_space<vmem>>, vector<24x24xf32>
    %cst_32 = arith.constant dense<0.000000e+00> : vector<8x24xf32>
    %49 = tpu.matmul %47, %48, %cst_32 {dimension_numbers = #tpu.dot_dimension_numbers<[1], [0], [0], [1], [0, 0, 1, 1], [], []>} : vector<8x24xf32>, vector<24x24xf32>, vector<8x24xf32> -> vector<8x24xf32>
    %c0_33 = arith.constant 0 : index
    %c0_34 = arith.constant 0 : index
    %50 = vector.load %arg11[%c0_33, %c0_34] : memref<1x24xf32, #tpu.memory_space<vmem>>, vector<1x24xf32>
    %51 = vector.broadcast %50 : vector<1x24xf32> to vector<8x24xf32>
    %52 = arith.addf %49, %51 : vector<8x24xf32>
    %c0_35 = arith.constant 0 : index
    %c0_36 = arith.constant 0 : index
    %53 = vector.load %arg12[%c0_35, %c0_36] : memref<24x24xf32, #tpu.memory_space<vmem>>, vector<24x24xf32>
    %c0_37 = arith.constant 0 : index
    %c0_38 = arith.constant 0 : index
    %54 = vector.load %arg13[%c0_37, %c0_38] : memref<24x24xf32, #tpu.memory_space<vmem>>, vector<24x24xf32>
    %c0_39 = arith.constant 0 : index
    %c0_40 = arith.constant 0 : index
    %55 = vector.load %arg14[%c0_39, %c0_40] : memref<24x24xf32, #tpu.memory_space<vmem>>, vector<24x24xf32>
    %c0_41 = arith.constant 0 : index
    %c0_42 = arith.constant 0 : index
    %56 = vector.load %arg15[%c0_41, %c0_42] : memref<24x24xf32, #tpu.memory_space<vmem>>, vector<24x24xf32>
    %c0_43 = arith.constant 0 : index
    %c0_44 = arith.constant 0 : index
    %57 = vector.load %arg16[%c0_43, %c0_44] : memref<24x24xf32, #tpu.memory_space<vmem>>, vector<24x24xf32>
    %c0_45 = arith.constant 0 : index
    %c0_46 = arith.constant 0 : index
    %58 = vector.load %arg17[%c0_45, %c0_46] : memref<24x24xf32, #tpu.memory_space<vmem>>, vector<24x24xf32>
    %c0_47 = arith.constant 0 : index
    %c0_48 = arith.constant 0 : index
    %59 = vector.load %arg18[%c0_47, %c0_48] : memref<1x24xf32, #tpu.memory_space<vmem>>, vector<1x24xf32>
    %c0_49 = arith.constant 0 : index
    %c0_50 = arith.constant 0 : index
    %60 = vector.load %arg19[%c0_49, %c0_50] : memref<1x24xf32, #tpu.memory_space<vmem>>, vector<1x24xf32>
    %c0_51 = arith.constant 0 : index
    %c0_52 = arith.constant 0 : index
    %61 = vector.load %arg20[%c0_51, %c0_52] : memref<1x24xf32, #tpu.memory_space<vmem>>, vector<1x24xf32>
    %c0_53 = arith.constant 0 : index
    %c0_54 = arith.constant 0 : index
    %62 = vector.load %arg21[%c0_53, %c0_54] : memref<1x24xf32, #tpu.memory_space<vmem>>, vector<1x24xf32>
    %c0_55 = arith.constant 0 : index
    %c0_56 = arith.constant 0 : index
    %63 = vector.load %arg22[%c0_55, %c0_56] : memref<1x24xf32, #tpu.memory_space<vmem>>, vector<1x24xf32>
    %c0_57 = arith.constant 0 : index
    %c0_58 = arith.constant 0 : index
    %64 = vector.load %arg23[%c0_57, %c0_58] : memref<1x24xf32, #tpu.memory_space<vmem>>, vector<1x24xf32>
    %cst_59 = arith.constant dense<0.000000e+00> : vector<8x24xf32>
    %65 = tpu.matmul %47, %53, %cst_59 {dimension_numbers = #tpu.dot_dimension_numbers<[1], [0], [0], [1], [0, 0, 1, 1], [], []>} : vector<8x24xf32>, vector<24x24xf32>, vector<8x24xf32> -> vector<8x24xf32>
    %66 = vector.broadcast %59 : vector<1x24xf32> to vector<8x24xf32>
    %67 = arith.addf %65, %66 : vector<8x24xf32>
    %c0_60 = arith.constant 0 : index
    %c0_61 = arith.constant 0 : index
    %68 = vector.load %arg32[%c0_60, %c0_61] : memref<8x24xf32, #tpu.memory_space<vmem>>, vector<8x24xf32>
    tpu.vector_store %arg32[%c0_60, %c0_61], %67 {strides = array<i32>} : memref<8x24xf32, #tpu.memory_space<vmem>>, vector<8x24xf32>,
    %cst_62 = arith.constant dense<0.000000e+00> : vector<8x24xf32>
    %69 = tpu.matmul %47, %54, %cst_62 {dimension_numbers = #tpu.dot_dimension_numbers<[1], [0], [0], [1], [0, 0, 1, 1], [], []>} : vector<8x24xf32>, vector<24x24xf32>, vector<8x24xf32> -> vector<8x24xf32>
    %70 = vector.broadcast %60 : vector<1x24xf32> to vector<8x24xf32>
    %71 = arith.addf %69, %70 : vector<8x24xf32>
    %c0_63 = arith.constant 0 : index
    %c0_64 = arith.constant 0 : index
    %72 = vector.load %arg33[%c0_63, %c0_64] : memref<8x24xf32, #tpu.memory_space<vmem>>, vector<8x24xf32>
    tpu.vector_store %arg33[%c0_63, %c0_64], %71 {strides = array<i32>} : memref<8x24xf32, #tpu.memory_space<vmem>>, vector<8x24xf32>,
    %cst_65 = arith.constant dense<0.000000e+00> : vector<8x24xf32>
    %73 = tpu.matmul %47, %55, %cst_65 {dimension_numbers = #tpu.dot_dimension_numbers<[1], [0], [0], [1], [0, 0, 1, 1], [], []>} : vector<8x24xf32>, vector<24x24xf32>, vector<8x24xf32> -> vector<8x24xf32>
    %74 = vector.broadcast %61 : vector<1x24xf32> to vector<8x24xf32>
    %75 = arith.addf %73, %74 : vector<8x24xf32>
    %c0_66 = arith.constant 0 : index
    %c0_67 = arith.constant 0 : index
    %76 = vector.load %arg34[%c0_66, %c0_67] : memref<8x24xf32, #tpu.memory_space<vmem>>, vector<8x24xf32>
    tpu.vector_store %arg34[%c0_66, %c0_67], %75 {strides = array<i32>} : memref<8x24xf32, #tpu.memory_space<vmem>>, vector<8x24xf32>,
    %cst_68 = arith.constant 0.000000e+00 : f32
    %77 = vector.broadcast %cst_68 : f32 to vector<1x24xf32>
    %cst_69 = arith.constant dense<0.000000e+00> : vector<1x24xf32>
    %78 = tpu.matmul %77, %56, %cst_69 {dimension_numbers = #tpu.dot_dimension_numbers<[1], [0], [0], [1], [0, 0, 1, 1], [], []>} : vector<1x24xf32>, vector<24x24xf32>, vector<1x24xf32> -> vector<1x24xf32>
    %79 = arith.addf %78, %62 : vector<1x24xf32>
    %cst_70 = arith.constant dense<0.000000e+00> : vector<1x24xf32>
    %80 = tpu.matmul %77, %57, %cst_70 {dimension_numbers = #tpu.dot_dimension_numbers<[1], [0], [0], [1], [0, 0, 1, 1], [], []>} : vector<1x24xf32>, vector<24x24xf32>, vector<1x24xf32> -> vector<1x24xf32>
    %81 = arith.addf %80, %63 : vector<1x24xf32>
    %cst_71 = arith.constant dense<0.000000e+00> : vector<1x24xf32>
    %82 = tpu.matmul %77, %58, %cst_71 {dimension_numbers = #tpu.dot_dimension_numbers<[1], [0], [0], [1], [0, 0, 1, 1], [], []>} : vector<1x24xf32>, vector<24x24xf32>, vector<1x24xf32> -> vector<1x24xf32>
    %83 = arith.addf %82, %64 : vector<1x24xf32>
    %c0_72 = arith.constant 0 : index
    %c0_73 = arith.constant 0 : index
    %84 = vector.load %arg32[%c0_72, %c0_73] : memref<8x24xf32, #tpu.memory_space<vmem>>, vector<1x24xf32>
    %85 = arith.addf %84, %79 : vector<1x24xf32>
    %cst_74 = arith.constant 0.000000e+00 : f32
    %86 = vector.broadcast %cst_74 : f32 to vector<1x24xf32>
    %87 = arith.subf %86, %85 : vector<1x24xf32>
    %88 = math.exp %87 : vector<1x24xf32>
    %cst_75 = arith.constant 1.000000e+00 : f32
    %89 = vector.broadcast %cst_75 : f32 to vector<1x24xf32>
    %90 = arith.addf %89, %88 : vector<1x24xf32>
    %91 = tpu.reciprocal %90 {approx = true} : vector<1x24xf32> -> vector<1x24xf32>
    %c0_76 = arith.constant 0 : index
    %c0_77 = arith.constant 0 : index
    %92 = vector.load %arg33[%c0_76, %c0_77] : memref<8x24xf32, #tpu.memory_space<vmem>>, vector<1x24xf32>
    %93 = arith.addf %92, %81 : vector<1x24xf32>
    %cst_78 = arith.constant 0.000000e+00 : f32
    %94 = vector.broadcast %cst_78 : f32 to vector<1x24xf32>
    %95 = arith.subf %94, %93 : vector<1x24xf32>
    %96 = math.exp %95 : vector<1x24xf32>
    %cst_79 = arith.constant 1.000000e+00 : f32
    %97 = vector.broadcast %cst_79 : f32 to vector<1x24xf32>
    %98 = arith.addf %97, %96 : vector<1x24xf32>
    %99 = tpu.reciprocal %98 {approx = true} : vector<1x24xf32> -> vector<1x24xf32>
    %c0_80 = arith.constant 0 : index
    %c0_81 = arith.constant 0 : index
    %100 = vector.load %arg34[%c0_80, %c0_81] : memref<8x24xf32, #tpu.memory_space<vmem>>, vector<1x24xf32>
    %101 = arith.mulf %91, %83 : vector<1x24xf32>
    %102 = arith.addf %100, %101 : vector<1x24xf32>
    %103 = math.tanh %102 : vector<1x24xf32>
    %cst_82 = arith.constant 1.000000e+00 : f32
    %104 = vector.broadcast %cst_82 : f32 to vector<1x24xf32>
    %105 = arith.subf %104, %99 : vector<1x24xf32>
    %106 = arith.mulf %105, %103 : vector<1x24xf32>
    %107 = arith.mulf %99, %77 : vector<1x24xf32>
    %108 = arith.addf %106, %107 : vector<1x24xf32>
    %c0_83 = arith.constant 0 : index
    %c0_84 = arith.constant 0 : index
    %109 = vector.load %arg35[%c0_83, %c0_84] : memref<8x24xf32, #tpu.memory_space<vmem>>, vector<1x24xf32>
    tpu.vector_store %arg35[%c0_83, %c0_84], %108 {strides = array<i32>} : memref<8x24xf32, #tpu.memory_space<vmem>>, vector<1x24xf32>,
    %cst_85 = arith.constant dense<0.000000e+00> : vector<1x24xf32>
    %110 = tpu.matmul %108, %56, %cst_85 {dimension_numbers = #tpu.dot_dimension_numbers<[1], [0], [0], [1], [0, 0, 1, 1], [], []>} : vector<1x24xf32>, vector<24x24xf32>, vector<1x24xf32> -> vector<1x24xf32>
    %111 = arith.addf %110, %62 : vector<1x24xf32>
    %cst_86 = arith.constant dense<0.000000e+00> : vector<1x24xf32>
    %112 = tpu.matmul %108, %57, %cst_86 {dimension_numbers = #tpu.dot_dimension_numbers<[1], [0], [0], [1], [0, 0, 1, 1], [], []>} : vector<1x24xf32>, vector<24x24xf32>, vector<1x24xf32> -> vector<1x24xf32>
    %113 = arith.addf %112, %63 : vector<1x24xf32>
    %cst_87 = arith.constant dense<0.000000e+00> : vector<1x24xf32>
    %114 = tpu.matmul %108, %58, %cst_87 {dimension_numbers = #tpu.dot_dimension_numbers<[1], [0], [0], [1], [0, 0, 1, 1], [], []>} : vector<1x24xf32>, vector<24x24xf32>, vector<1x24xf32> -> vector<1x24xf32>
    %115 = arith.addf %114, %64 : vector<1x24xf32>
    %c1 = arith.constant 1 : index
    %c0_88 = arith.constant 0 : index
    %116 = vector.load %arg32[%c1, %c0_88] : memref<8x24xf32, #tpu.memory_space<vmem>>, vector<1x24xf32>
    %117 = arith.addf %116, %111 : vector<1x24xf32>
    %cst_89 = arith.constant 0.000000e+00 : f32
    %118 = vector.broadcast %cst_89 : f32 to vector<1x24xf32>
    %119 = arith.subf %118, %117 : vector<1x24xf32>
    %120 = math.exp %119 : vector<1x24xf32>
    %cst_90 = arith.constant 1.000000e+00 : f32
    %121 = vector.broadcast %cst_90 : f32 to vector<1x24xf32>
    %122 = arith.addf %121, %120 : vector<1x24xf32>
    %123 = tpu.reciprocal %122 {approx = true} : vector<1x24xf32> -> vector<1x24xf32>
    %c1_91 = arith.constant 1 : index
    %c0_92 = arith.constant 0 : index
    %124 = vector.load %arg33[%c1_91, %c0_92] : memref<8x24xf32, #tpu.memory_space<vmem>>, vector<1x24xf32>
    %125 = arith.addf %124, %113 : vector<1x24xf32>
    %cst_93 = arith.constant 0.000000e+00 : f32
    %126 = vector.broadcast %cst_93 : f32 to vector<1x24xf32>
    %127 = arith.subf %126, %125 : vector<1x24xf32>
    %128 = math.exp %127 : vector<1x24xf32>
    %cst_94 = arith.constant 1.000000e+00 : f32
    %129 = vector.broadcast %cst_94 : f32 to vector<1x24xf32>
    %130 = arith.addf %129, %128 : vector<1x24xf32>
    %131 = tpu.reciprocal %130 {approx = true} : vector<1x24xf32> -> vector<1x24xf32>
    %c1_95 = arith.constant 1 : index
    %c0_96 = arith.constant 0 : index
    %132 = vector.load %arg34[%c1_95, %c0_96] : memref<8x24xf32, #tpu.memory_space<vmem>>, vector<1x24xf32>
    %133 = arith.mulf %123, %115 : vector<1x24xf32>
    %134 = arith.addf %132, %133 : vector<1x24xf32>
    %135 = math.tanh %134 : vector<1x24xf32>
    %cst_97 = arith.constant 1.000000e+00 : f32
    %136 = vector.broadcast %cst_97 : f32 to vector<1x24xf32>
    %137 = arith.subf %136, %131 : vector<1x24xf32>
    %138 = arith.mulf %137, %135 : vector<1x24xf32>
    %139 = arith.mulf %131, %108 : vector<1x24xf32>
    %140 = arith.addf %138, %139 : vector<1x24xf32>
    %c1_98 = arith.constant 1 : index
    %c0_99 = arith.constant 0 : index
    %141 = vector.load %arg35[%c1_98, %c0_99] : memref<8x24xf32, #tpu.memory_space<vmem>>, vector<1x24xf32>
    tpu.vector_store %arg35[%c1_98, %c0_99], %140 {strides = array<i32>} : memref<8x24xf32, #tpu.memory_space<vmem>>, vector<1x24xf32>,
    %cst_100 = arith.constant dense<0.000000e+00> : vector<1x24xf32>
    %142 = tpu.matmul %140, %56, %cst_100 {dimension_numbers = #tpu.dot_dimension_numbers<[1], [0], [0], [1], [0, 0, 1, 1], [], []>} : vector<1x24xf32>, vector<24x24xf32>, vector<1x24xf32> -> vector<1x24xf32>
    %143 = arith.addf %142, %62 : vector<1x24xf32>
    %cst_101 = arith.constant dense<0.000000e+00> : vector<1x24xf32>
    %144 = tpu.matmul %140, %57, %cst_101 {dimension_numbers = #tpu.dot_dimension_numbers<[1], [0], [0], [1], [0, 0, 1, 1], [], []>} : vector<1x24xf32>, vector<24x24xf32>, vector<1x24xf32> -> vector<1x24xf32>
    %145 = arith.addf %144, %63 : vector<1x24xf32>
    %cst_102 = arith.constant dense<0.000000e+00> : vector<1x24xf32>
    %146 = tpu.matmul %140, %58, %cst_102 {dimension_numbers = #tpu.dot_dimension_numbers<[1], [0], [0], [1], [0, 0, 1, 1], [], []>} : vector<1x24xf32>, vector<24x24xf32>, vector<1x24xf32> -> vector<1x24xf32>
    %147 = arith.addf %146, %64 : vector<1x24xf32>
    %c2 = arith.constant 2 : index
    %c0_103 = arith.constant 0 : index
    %148 = vector.load %arg32[%c2, %c0_103] : memref<8x24xf32, #tpu.memory_space<vmem>>, vector<1x24xf32>
    %149 = arith.addf %148, %143 : vector<1x24xf32>
    %cst_104 = arith.constant 0.000000e+00 : f32
    %150 = vector.broadcast %cst_104 : f32 to vector<1x24xf32>
    %151 = arith.subf %150, %149 : vector<1x24xf32>
    %152 = math.exp %151 : vector<1x24xf32>
    %cst_105 = arith.constant 1.000000e+00 : f32
    %153 = vector.broadcast %cst_105 : f32 to vector<1x24xf32>
    %154 = arith.addf %153, %152 : vector<1x24xf32>
    %155 = tpu.reciprocal %154 {approx = true} : vector<1x24xf32> -> vector<1x24xf32>
    %c2_106 = arith.constant 2 : index
    %c0_107 = arith.constant 0 : index
    %156 = vector.load %arg33[%c2_106, %c0_107] : memref<8x24xf32, #tpu.memory_space<vmem>>, vector<1x24xf32>
    %157 = arith.addf %156, %145 : vector<1x24xf32>
    %cst_108 = arith.constant 0.000000e+00 : f32
    %158 = vector.broadcast %cst_108 : f32 to vector<1x24xf32>
    %159 = arith.subf %158, %157 : vector<1x24xf32>
    %160 = math.exp %159 : vector<1x24xf32>
    %cst_109 = arith.constant 1.000000e+00 : f32
    %161 = vector.broadcast %cst_109 : f32 to vector<1x24xf32>
    %162 = arith.addf %161, %160 : vector<1x24xf32>
    %163 = tpu.reciprocal %162 {approx = true} : vector<1x24xf32> -> vector<1x24xf32>
    %c2_110 = arith.constant 2 : index
    %c0_111 = arith.constant 0 : index
    %164 = vector.load %arg34[%c2_110, %c0_111] : memref<8x24xf32, #tpu.memory_space<vmem>>, vector<1x24xf32>
    %165 = arith.mulf %155, %147 : vector<1x24xf32>
    %166 = arith.addf %164, %165 : vector<1x24xf32>
    %167 = math.tanh %166 : vector<1x24xf32>
    %cst_112 = arith.constant 1.000000e+00 : f32
    %168 = vector.broadcast %cst_112 : f32 to vector<1x24xf32>
    %169 = arith.subf %168, %163 : vector<1x24xf32>
    %170 = arith.mulf %169, %167 : vector<1x24xf32>
    %171 = arith.mulf %163, %140 : vector<1x24xf32>
    %172 = arith.addf %170, %171 : vector<1x24xf32>
    %c2_113 = arith.constant 2 : index
    %c0_114 = arith.constant 0 : index
    %173 = vector.load %arg35[%c2_113, %c0_114] : memref<8x24xf32, #tpu.memory_space<vmem>>, vector<1x24xf32>
    tpu.vector_store %arg35[%c2_113, %c0_114], %172 {strides = array<i32>} : memref<8x24xf32, #tpu.memory_space<vmem>>, vector<1x24xf32>,
    %cst_115 = arith.constant dense<0.000000e+00> : vector<1x24xf32>
    %174 = tpu.matmul %172, %56, %cst_115 {dimension_numbers = #tpu.dot_dimension_numbers<[1], [0], [0], [1], [0, 0, 1, 1], [], []>} : vector<1x24xf32>, vector<24x24xf32>, vector<1x24xf32> -> vector<1x24xf32>
    %175 = arith.addf %174, %62 : vector<1x24xf32>
    %cst_116 = arith.constant dense<0.000000e+00> : vector<1x24xf32>
    %176 = tpu.matmul %172, %57, %cst_116 {dimension_numbers = #tpu.dot_dimension_numbers<[1], [0], [0], [1], [0, 0, 1, 1], [], []>} : vector<1x24xf32>, vector<24x24xf32>, vector<1x24xf32> -> vector<1x24xf32>
    %177 = arith.addf %176, %63 : vector<1x24xf32>
    %cst_117 = arith.constant dense<0.000000e+00> : vector<1x24xf32>
    %178 = tpu.matmul %172, %58, %cst_117 {dimension_numbers = #tpu.dot_dimension_numbers<[1], [0], [0], [1], [0, 0, 1, 1], [], []>} : vector<1x24xf32>, vector<24x24xf32>, vector<1x24xf32> -> vector<1x24xf32>
    %179 = arith.addf %178, %64 : vector<1x24xf32>
    %c3 = arith.constant 3 : index
    %c0_118 = arith.constant 0 : index
    %180 = vector.load %arg32[%c3, %c0_118] : memref<8x24xf32, #tpu.memory_space<vmem>>, vector<1x24xf32>
    %181 = arith.addf %180, %175 : vector<1x24xf32>
    %cst_119 = arith.constant 0.000000e+00 : f32
    %182 = vector.broadcast %cst_119 : f32 to vector<1x24xf32>
    %183 = arith.subf %182, %181 : vector<1x24xf32>
    %184 = math.exp %183 : vector<1x24xf32>
    %cst_120 = arith.constant 1.000000e+00 : f32
    %185 = vector.broadcast %cst_120 : f32 to vector<1x24xf32>
    %186 = arith.addf %185, %184 : vector<1x24xf32>
    %187 = tpu.reciprocal %186 {approx = true} : vector<1x24xf32> -> vector<1x24xf32>
    %c3_121 = arith.constant 3 : index
    %c0_122 = arith.constant 0 : index
    %188 = vector.load %arg33[%c3_121, %c0_122] : memref<8x24xf32, #tpu.memory_space<vmem>>, vector<1x24xf32>
    %189 = arith.addf %188, %177 : vector<1x24xf32>
    %cst_123 = arith.constant 0.000000e+00 : f32
    %190 = vector.broadcast %cst_123 : f32 to vector<1x24xf32>
    %191 = arith.subf %190, %189 : vector<1x24xf32>
    %192 = math.exp %191 : vector<1x24xf32>
    %cst_124 = arith.constant 1.000000e+00 : f32
    %193 = vector.broadcast %cst_124 : f32 to vector<1x24xf32>
    %194 = arith.addf %193, %192 : vector<1x24xf32>
    %195 = tpu.reciprocal %194 {approx = true} : vector<1x24xf32> -> vector<1x24xf32>
    %c3_125 = arith.constant 3 : index
    %c0_126 = arith.constant 0 : index
    %196 = vector.load %arg34[%c3_125, %c0_126] : memref<8x24xf32, #tpu.memory_space<vmem>>, vector<1x24xf32>
    %197 = arith.mulf %187, %179 : vector<1x24xf32>
    %198 = arith.addf %196, %197 : vector<1x24xf32>
    %199 = math.tanh %198 : vector<1x24xf32>
    %cst_127 = arith.constant 1.000000e+00 : f32
    %200 = vector.broadcast %cst_127 : f32 to vector<1x24xf32>
    %201 = arith.subf %200, %195 : vector<1x24xf32>
    %202 = arith.mulf %201, %199 : vector<1x24xf32>
    %203 = arith.mulf %195, %172 : vector<1x24xf32>
    %204 = arith.addf %202, %203 : vector<1x24xf32>
    %c3_128 = arith.constant 3 : index
    %c0_129 = arith.constant 0 : index
    %205 = vector.load %arg35[%c3_128, %c0_129] : memref<8x24xf32, #tpu.memory_space<vmem>>, vector<1x24xf32>
    tpu.vector_store %arg35[%c3_128, %c0_129], %204 {strides = array<i32>} : memref<8x24xf32, #tpu.memory_space<vmem>>, vector<1x24xf32>,
    %cst_130 = arith.constant dense<0.000000e+00> : vector<1x24xf32>
    %206 = tpu.matmul %204, %56, %cst_130 {dimension_numbers = #tpu.dot_dimension_numbers<[1], [0], [0], [1], [0, 0, 1, 1], [], []>} : vector<1x24xf32>, vector<24x24xf32>, vector<1x24xf32> -> vector<1x24xf32>
    %207 = arith.addf %206, %62 : vector<1x24xf32>
    %cst_131 = arith.constant dense<0.000000e+00> : vector<1x24xf32>
    %208 = tpu.matmul %204, %57, %cst_131 {dimension_numbers = #tpu.dot_dimension_numbers<[1], [0], [0], [1], [0, 0, 1, 1], [], []>} : vector<1x24xf32>, vector<24x24xf32>, vector<1x24xf32> -> vector<1x24xf32>
    %209 = arith.addf %208, %63 : vector<1x24xf32>
    %cst_132 = arith.constant dense<0.000000e+00> : vector<1x24xf32>
    %210 = tpu.matmul %204, %58, %cst_132 {dimension_numbers = #tpu.dot_dimension_numbers<[1], [0], [0], [1], [0, 0, 1, 1], [], []>} : vector<1x24xf32>, vector<24x24xf32>, vector<1x24xf32> -> vector<1x24xf32>
    %211 = arith.addf %210, %64 : vector<1x24xf32>
    %c4 = arith.constant 4 : index
    %c0_133 = arith.constant 0 : index
    %212 = vector.load %arg32[%c4, %c0_133] : memref<8x24xf32, #tpu.memory_space<vmem>>, vector<1x24xf32>
    %213 = arith.addf %212, %207 : vector<1x24xf32>
    %cst_134 = arith.constant 0.000000e+00 : f32
    %214 = vector.broadcast %cst_134 : f32 to vector<1x24xf32>
    %215 = arith.subf %214, %213 : vector<1x24xf32>
    %216 = math.exp %215 : vector<1x24xf32>
    %cst_135 = arith.constant 1.000000e+00 : f32
    %217 = vector.broadcast %cst_135 : f32 to vector<1x24xf32>
    %218 = arith.addf %217, %216 : vector<1x24xf32>
    %219 = tpu.reciprocal %218 {approx = true} : vector<1x24xf32> -> vector<1x24xf32>
    %c4_136 = arith.constant 4 : index
    %c0_137 = arith.constant 0 : index
    %220 = vector.load %arg33[%c4_136, %c0_137] : memref<8x24xf32, #tpu.memory_space<vmem>>, vector<1x24xf32>
    %221 = arith.addf %220, %209 : vector<1x24xf32>
    %cst_138 = arith.constant 0.000000e+00 : f32
    %222 = vector.broadcast %cst_138 : f32 to vector<1x24xf32>
    %223 = arith.subf %222, %221 : vector<1x24xf32>
    %224 = math.exp %223 : vector<1x24xf32>
    %cst_139 = arith.constant 1.000000e+00 : f32
    %225 = vector.broadcast %cst_139 : f32 to vector<1x24xf32>
    %226 = arith.addf %225, %224 : vector<1x24xf32>
    %227 = tpu.reciprocal %226 {approx = true} : vector<1x24xf32> -> vector<1x24xf32>
    %c4_140 = arith.constant 4 : index
    %c0_141 = arith.constant 0 : index
    %228 = vector.load %arg34[%c4_140, %c0_141] : memref<8x24xf32, #tpu.memory_space<vmem>>, vector<1x24xf32>
    %229 = arith.mulf %219, %211 : vector<1x24xf32>
    %230 = arith.addf %228, %229 : vector<1x24xf32>
    %231 = math.tanh %230 : vector<1x24xf32>
    %cst_142 = arith.constant 1.000000e+00 : f32
    %232 = vector.broadcast %cst_142 : f32 to vector<1x24xf32>
    %233 = arith.subf %232, %227 : vector<1x24xf32>
    %234 = arith.mulf %233, %231 : vector<1x24xf32>
    %235 = arith.mulf %227, %204 : vector<1x24xf32>
    %236 = arith.addf %234, %235 : vector<1x24xf32>
    %c4_143 = arith.constant 4 : index
    %c0_144 = arith.constant 0 : index
    %237 = vector.load %arg35[%c4_143, %c0_144] : memref<8x24xf32, #tpu.memory_space<vmem>>, vector<1x24xf32>
    tpu.vector_store %arg35[%c4_143, %c0_144], %236 {strides = array<i32>} : memref<8x24xf32, #tpu.memory_space<vmem>>, vector<1x24xf32>,
    %cst_145 = arith.constant dense<0.000000e+00> : vector<1x24xf32>
    %238 = tpu.matmul %236, %56, %cst_145 {dimension_numbers = #tpu.dot_dimension_numbers<[1], [0], [0], [1], [0, 0, 1, 1], [], []>} : vector<1x24xf32>, vector<24x24xf32>, vector<1x24xf32> -> vector<1x24xf32>
    %239 = arith.addf %238, %62 : vector<1x24xf32>
    %cst_146 = arith.constant dense<0.000000e+00> : vector<1x24xf32>
    %240 = tpu.matmul %236, %57, %cst_146 {dimension_numbers = #tpu.dot_dimension_numbers<[1], [0], [0], [1], [0, 0, 1, 1], [], []>} : vector<1x24xf32>, vector<24x24xf32>, vector<1x24xf32> -> vector<1x24xf32>
    %241 = arith.addf %240, %63 : vector<1x24xf32>
    %cst_147 = arith.constant dense<0.000000e+00> : vector<1x24xf32>
    %242 = tpu.matmul %236, %58, %cst_147 {dimension_numbers = #tpu.dot_dimension_numbers<[1], [0], [0], [1], [0, 0, 1, 1], [], []>} : vector<1x24xf32>, vector<24x24xf32>, vector<1x24xf32> -> vector<1x24xf32>
    %243 = arith.addf %242, %64 : vector<1x24xf32>
    %c5 = arith.constant 5 : index
    %c0_148 = arith.constant 0 : index
    %244 = vector.load %arg32[%c5, %c0_148] : memref<8x24xf32, #tpu.memory_space<vmem>>, vector<1x24xf32>
    %245 = arith.addf %244, %239 : vector<1x24xf32>
    %cst_149 = arith.constant 0.000000e+00 : f32
    %246 = vector.broadcast %cst_149 : f32 to vector<1x24xf32>
    %247 = arith.subf %246, %245 : vector<1x24xf32>
    %248 = math.exp %247 : vector<1x24xf32>
    %cst_150 = arith.constant 1.000000e+00 : f32
    %249 = vector.broadcast %cst_150 : f32 to vector<1x24xf32>
    %250 = arith.addf %249, %248 : vector<1x24xf32>
    %251 = tpu.reciprocal %250 {approx = true} : vector<1x24xf32> -> vector<1x24xf32>
    %c5_151 = arith.constant 5 : index
    %c0_152 = arith.constant 0 : index
    %252 = vector.load %arg33[%c5_151, %c0_152] : memref<8x24xf32, #tpu.memory_space<vmem>>, vector<1x24xf32>
    %253 = arith.addf %252, %241 : vector<1x24xf32>
    %cst_153 = arith.constant 0.000000e+00 : f32
    %254 = vector.broadcast %cst_153 : f32 to vector<1x24xf32>
    %255 = arith.subf %254, %253 : vector<1x24xf32>
    %256 = math.exp %255 : vector<1x24xf32>
    %cst_154 = arith.constant 1.000000e+00 : f32
    %257 = vector.broadcast %cst_154 : f32 to vector<1x24xf32>
    %258 = arith.addf %257, %256 : vector<1x24xf32>
    %259 = tpu.reciprocal %258 {approx = true} : vector<1x24xf32> -> vector<1x24xf32>
    %c5_155 = arith.constant 5 : index
    %c0_156 = arith.constant 0 : index
    %260 = vector.load %arg34[%c5_155, %c0_156] : memref<8x24xf32, #tpu.memory_space<vmem>>, vector<1x24xf32>
    %261 = arith.mulf %251, %243 : vector<1x24xf32>
    %262 = arith.addf %260, %261 : vector<1x24xf32>
    %263 = math.tanh %262 : vector<1x24xf32>
    %cst_157 = arith.constant 1.000000e+00 : f32
    %264 = vector.broadcast %cst_157 : f32 to vector<1x24xf32>
    %265 = arith.subf %264, %259 : vector<1x24xf32>
    %266 = arith.mulf %265, %263 : vector<1x24xf32>
    %267 = arith.mulf %259, %236 : vector<1x24xf32>
    %268 = arith.addf %266, %267 : vector<1x24xf32>
    %c5_158 = arith.constant 5 : index
    %c0_159 = arith.constant 0 : index
    %269 = vector.load %arg35[%c5_158, %c0_159] : memref<8x24xf32, #tpu.memory_space<vmem>>, vector<1x24xf32>
    tpu.vector_store %arg35[%c5_158, %c0_159], %268 {strides = array<i32>} : memref<8x24xf32, #tpu.memory_space<vmem>>, vector<1x24xf32>,
    %cst_160 = arith.constant dense<0.000000e+00> : vector<1x24xf32>
    %270 = tpu.matmul %268, %56, %cst_160 {dimension_numbers = #tpu.dot_dimension_numbers<[1], [0], [0], [1], [0, 0, 1, 1], [], []>} : vector<1x24xf32>, vector<24x24xf32>, vector<1x24xf32> -> vector<1x24xf32>
    %271 = arith.addf %270, %62 : vector<1x24xf32>
    %cst_161 = arith.constant dense<0.000000e+00> : vector<1x24xf32>
    %272 = tpu.matmul %268, %57, %cst_161 {dimension_numbers = #tpu.dot_dimension_numbers<[1], [0], [0], [1], [0, 0, 1, 1], [], []>} : vector<1x24xf32>, vector<24x24xf32>, vector<1x24xf32> -> vector<1x24xf32>
    %273 = arith.addf %272, %63 : vector<1x24xf32>
    %cst_162 = arith.constant dense<0.000000e+00> : vector<1x24xf32>
    %274 = tpu.matmul %268, %58, %cst_162 {dimension_numbers = #tpu.dot_dimension_numbers<[1], [0], [0], [1], [0, 0, 1, 1], [], []>} : vector<1x24xf32>, vector<24x24xf32>, vector<1x24xf32> -> vector<1x24xf32>
    %275 = arith.addf %274, %64 : vector<1x24xf32>
    %c6 = arith.constant 6 : index
    %c0_163 = arith.constant 0 : index
    %276 = vector.load %arg32[%c6, %c0_163] : memref<8x24xf32, #tpu.memory_space<vmem>>, vector<1x24xf32>
    %277 = arith.addf %276, %271 : vector<1x24xf32>
    %cst_164 = arith.constant 0.000000e+00 : f32
    %278 = vector.broadcast %cst_164 : f32 to vector<1x24xf32>
    %279 = arith.subf %278, %277 : vector<1x24xf32>
    %280 = math.exp %279 : vector<1x24xf32>
    %cst_165 = arith.constant 1.000000e+00 : f32
    %281 = vector.broadcast %cst_165 : f32 to vector<1x24xf32>
    %282 = arith.addf %281, %280 : vector<1x24xf32>
    %283 = tpu.reciprocal %282 {approx = true} : vector<1x24xf32> -> vector<1x24xf32>
    %c6_166 = arith.constant 6 : index
    %c0_167 = arith.constant 0 : index
    %284 = vector.load %arg33[%c6_166, %c0_167] : memref<8x24xf32, #tpu.memory_space<vmem>>, vector<1x24xf32>
    %285 = arith.addf %284, %273 : vector<1x24xf32>
    %cst_168 = arith.constant 0.000000e+00 : f32
    %286 = vector.broadcast %cst_168 : f32 to vector<1x24xf32>
    %287 = arith.subf %286, %285 : vector<1x24xf32>
    %288 = math.exp %287 : vector<1x24xf32>
    %cst_169 = arith.constant 1.000000e+00 : f32
    %289 = vector.broadcast %cst_169 : f32 to vector<1x24xf32>
    %290 = arith.addf %289, %288 : vector<1x24xf32>
    %291 = tpu.reciprocal %290 {approx = true} : vector<1x24xf32> -> vector<1x24xf32>
    %c6_170 = arith.constant 6 : index
    %c0_171 = arith.constant 0 : index
    %292 = vector.load %arg34[%c6_170, %c0_171] : memref<8x24xf32, #tpu.memory_space<vmem>>, vector<1x24xf32>
    %293 = arith.mulf %283, %275 : vector<1x24xf32>
    %294 = arith.addf %292, %293 : vector<1x24xf32>
    %295 = math.tanh %294 : vector<1x24xf32>
    %cst_172 = arith.constant 1.000000e+00 : f32
    %296 = vector.broadcast %cst_172 : f32 to vector<1x24xf32>
    %297 = arith.subf %296, %291 : vector<1x24xf32>
    %298 = arith.mulf %297, %295 : vector<1x24xf32>
    %299 = arith.mulf %291, %268 : vector<1x24xf32>
    %300 = arith.addf %298, %299 : vector<1x24xf32>
    %c6_173 = arith.constant 6 : index
    %c0_174 = arith.constant 0 : index
    %301 = vector.load %arg35[%c6_173, %c0_174] : memref<8x24xf32, #tpu.memory_space<vmem>>, vector<1x24xf32>
    tpu.vector_store %arg35[%c6_173, %c0_174], %300 {strides = array<i32>} : memref<8x24xf32, #tpu.memory_space<vmem>>, vector<1x24xf32>,
    %cst_175 = arith.constant dense<0.000000e+00> : vector<1x24xf32>
    %302 = tpu.matmul %300, %56, %cst_175 {dimension_numbers = #tpu.dot_dimension_numbers<[1], [0], [0], [1], [0, 0, 1, 1], [], []>} : vector<1x24xf32>, vector<24x24xf32>, vector<1x24xf32> -> vector<1x24xf32>
    %303 = arith.addf %302, %62 : vector<1x24xf32>
    %cst_176 = arith.constant dense<0.000000e+00> : vector<1x24xf32>
    %304 = tpu.matmul %300, %57, %cst_176 {dimension_numbers = #tpu.dot_dimension_numbers<[1], [0], [0], [1], [0, 0, 1, 1], [], []>} : vector<1x24xf32>, vector<24x24xf32>, vector<1x24xf32> -> vector<1x24xf32>
    %305 = arith.addf %304, %63 : vector<1x24xf32>
    %cst_177 = arith.constant dense<0.000000e+00> : vector<1x24xf32>
    %306 = tpu.matmul %300, %58, %cst_177 {dimension_numbers = #tpu.dot_dimension_numbers<[1], [0], [0], [1], [0, 0, 1, 1], [], []>} : vector<1x24xf32>, vector<24x24xf32>, vector<1x24xf32> -> vector<1x24xf32>
    %307 = arith.addf %306, %64 : vector<1x24xf32>
    %c7 = arith.constant 7 : index
    %c0_178 = arith.constant 0 : index
    %308 = vector.load %arg32[%c7, %c0_178] : memref<8x24xf32, #tpu.memory_space<vmem>>, vector<1x24xf32>
    %309 = arith.addf %308, %303 : vector<1x24xf32>
    %cst_179 = arith.constant 0.000000e+00 : f32
    %310 = vector.broadcast %cst_179 : f32 to vector<1x24xf32>
    %311 = arith.subf %310, %309 : vector<1x24xf32>
    %312 = math.exp %311 : vector<1x24xf32>
    %cst_180 = arith.constant 1.000000e+00 : f32
    %313 = vector.broadcast %cst_180 : f32 to vector<1x24xf32>
    %314 = arith.addf %313, %312 : vector<1x24xf32>
    %315 = tpu.reciprocal %314 {approx = true} : vector<1x24xf32> -> vector<1x24xf32>
    %c7_181 = arith.constant 7 : index
    %c0_182 = arith.constant 0 : index
    %316 = vector.load %arg33[%c7_181, %c0_182] : memref<8x24xf32, #tpu.memory_space<vmem>>, vector<1x24xf32>
    %317 = arith.addf %316, %305 : vector<1x24xf32>
    %cst_183 = arith.constant 0.000000e+00 : f32
    %318 = vector.broadcast %cst_183 : f32 to vector<1x24xf32>
    %319 = arith.subf %318, %317 : vector<1x24xf32>
    %320 = math.exp %319 : vector<1x24xf32>
    %cst_184 = arith.constant 1.000000e+00 : f32
    %321 = vector.broadcast %cst_184 : f32 to vector<1x24xf32>
    %322 = arith.addf %321, %320 : vector<1x24xf32>
    %323 = tpu.reciprocal %322 {approx = true} : vector<1x24xf32> -> vector<1x24xf32>
    %c7_185 = arith.constant 7 : index
    %c0_186 = arith.constant 0 : index
    %324 = vector.load %arg34[%c7_185, %c0_186] : memref<8x24xf32, #tpu.memory_space<vmem>>, vector<1x24xf32>
    %325 = arith.mulf %315, %307 : vector<1x24xf32>
    %326 = arith.addf %324, %325 : vector<1x24xf32>
    %327 = math.tanh %326 : vector<1x24xf32>
    %cst_187 = arith.constant 1.000000e+00 : f32
    %328 = vector.broadcast %cst_187 : f32 to vector<1x24xf32>
    %329 = arith.subf %328, %323 : vector<1x24xf32>
    %330 = arith.mulf %329, %327 : vector<1x24xf32>
    %331 = arith.mulf %323, %300 : vector<1x24xf32>
    %332 = arith.addf %330, %331 : vector<1x24xf32>
    %c7_188 = arith.constant 7 : index
    %c0_189 = arith.constant 0 : index
    %333 = vector.load %arg35[%c7_188, %c0_189] : memref<8x24xf32, #tpu.memory_space<vmem>>, vector<1x24xf32>
    tpu.vector_store %arg35[%c7_188, %c0_189], %332 {strides = array<i32>} : memref<8x24xf32, #tpu.memory_space<vmem>>, vector<1x24xf32>,
    %c0_190 = arith.constant 0 : index
    %c0_191 = arith.constant 0 : index
    %334 = vector.load %arg35[%c0_190, %c0_191] : memref<8x24xf32, #tpu.memory_space<vmem>>, vector<8x24xf32>
    %c0_192 = arith.constant 0 : index
    %c0_193 = arith.constant 0 : index
    %c0_194 = arith.constant 0 : index
    %335 = vector.load %arg31[%c0_192, %c0_193, %c0_194] : memref<1x8x24xf32, #tpu.memory_space<vmem>>, vector<1x8x24xf32>
    %336 = vector.shape_cast %335 : vector<1x8x24xf32> to vector<8x24xf32>
    %337 = vector.shape_cast %334 : vector<8x24xf32> to vector<1x8x24xf32>
    tpu.vector_store %arg31[%c0_192, %c0_193, %c0_194], %337 {strides = array<i32>} : memref<1x8x24xf32, #tpu.memory_space<vmem>>, vector<1x8x24xf32>,
    %338 = arith.addf %334, %52 : vector<8x24xf32>
    %c0_195 = arith.constant 0 : index
    %c0_196 = arith.constant 0 : index
    %339 = vector.load %arg24[%c0_195, %c0_196] : memref<24x28xf32, #tpu.memory_space<vmem>>, vector<24x28xf32>
    %cst_197 = arith.constant dense<0.000000e+00> : vector<8x28xf32>
    %340 = tpu.matmul %338, %339, %cst_197 {dimension_numbers = #tpu.dot_dimension_numbers<[1], [0], [0], [1], [0, 0, 1, 1], [], []>} : vector<8x24xf32>, vector<24x28xf32>, vector<8x28xf32> -> vector<8x28xf32>
    %c0_198 = arith.constant 0 : index
    %c0_199 = arith.constant 0 : index
    %341 = vector.load %arg26[%c0_198, %c0_199] : memref<1x28xf32, #tpu.memory_space<vmem>>, vector<1x28xf32>
    %342 = vector.broadcast %341 : vector<1x28xf32> to vector<8x28xf32>
    %343 = arith.addf %340, %342 : vector<8x28xf32>
    %cst_200 = arith.constant dense<0.000000e+00> : vector<8x24xf32>
    %344 = tpu.matmul %13, %338, %cst_200 {dimension_numbers = #tpu.dot_dimension_numbers<[1], [0], [0], [1], [0, 0, 1, 1], [], []>} : vector<8x8xf32>, vector<8x24xf32>, vector<8x24xf32> -> vector<8x24xf32>
    %c0_201 = arith.constant 0 : index
    %c0_202 = arith.constant 0 : index
    %345 = vector.load %arg25[%c0_201, %c0_202] : memref<24x28xf32, #tpu.memory_space<vmem>>, vector<24x28xf32>
    %cst_203 = arith.constant dense<0.000000e+00> : vector<8x28xf32>
    %346 = tpu.matmul %344, %345, %cst_203 {dimension_numbers = #tpu.dot_dimension_numbers<[1], [0], [0], [1], [0, 0, 1, 1], [], []>} : vector<8x24xf32>, vector<24x28xf32>, vector<8x28xf32> -> vector<8x28xf32>
    %347 = arith.addf %343, %346 : vector<8x28xf32>
    %cst_204 = arith.constant 0.000000e+00 : f32
    %348 = vector.broadcast %cst_204 : f32 to vector<8x28xf32>
    %349 = arith.cmpf ogt, %347, %348 : vector<8x28xf32>
    %cst_205 = arith.constant 0.000000e+00 : f32
    %350 = vector.broadcast %cst_205 : f32 to vector<8x28xf32>
    %351 = arith.minimumf %347, %350 : vector<8x28xf32>
    %352 = math.exp %351 : vector<8x28xf32>
    %cst_206 = arith.constant 1.000000e+00 : f32
    %353 = vector.broadcast %cst_206 : f32 to vector<8x28xf32>
    %354 = arith.subf %352, %353 : vector<8x28xf32>
    %355 = arith.select %349, %347, %354 : vector<8x28xi1>, vector<8x28xf32>
    %356 = arith.addf %355, %30 : vector<8x28xf32>
    %c0_207 = arith.constant 0 : index
    %c0_208 = arith.constant 0 : index
    %357 = vector.load %arg27[%c0_207, %c0_208] : memref<28x32xf32, #tpu.memory_space<vmem>>, vector<28x32xf32>
    %cst_209 = arith.constant dense<0.000000e+00> : vector<8x32xf32>
    %358 = tpu.matmul %356, %357, %cst_209 {dimension_numbers = #tpu.dot_dimension_numbers<[1], [0], [0], [1], [0, 0, 1, 1], [], []>} : vector<8x28xf32>, vector<28x32xf32>, vector<8x32xf32> -> vector<8x32xf32>
    %c0_210 = arith.constant 0 : index
    %c0_211 = arith.constant 0 : index
    %359 = vector.load %arg29[%c0_210, %c0_211] : memref<1x32xf32, #tpu.memory_space<vmem>>, vector<1x32xf32>
    %360 = vector.broadcast %359 : vector<1x32xf32> to vector<8x32xf32>
    %361 = arith.addf %358, %360 : vector<8x32xf32>
    %cst_212 = arith.constant dense<0.000000e+00> : vector<8x28xf32>
    %362 = tpu.matmul %13, %356, %cst_212 {dimension_numbers = #tpu.dot_dimension_numbers<[1], [0], [0], [1], [0, 0, 1, 1], [], []>} : vector<8x8xf32>, vector<8x28xf32>, vector<8x28xf32> -> vector<8x28xf32>
    %c0_213 = arith.constant 0 : index
    %c0_214 = arith.constant 0 : index
    %363 = vector.load %arg28[%c0_213, %c0_214] : memref<28x32xf32, #tpu.memory_space<vmem>>, vector<28x32xf32>
    %cst_215 = arith.constant dense<0.000000e+00> : vector<8x32xf32>
    %364 = tpu.matmul %362, %363, %cst_215 {dimension_numbers = #tpu.dot_dimension_numbers<[1], [0], [0], [1], [0, 0, 1, 1], [], []>} : vector<8x28xf32>, vector<28x32xf32>, vector<8x32xf32> -> vector<8x32xf32>
    %365 = arith.addf %361, %364 : vector<8x32xf32>
    %cst_216 = arith.constant 0.000000e+00 : f32
    %366 = vector.broadcast %cst_216 : f32 to vector<8x32xf32>
    %367 = arith.subf %366, %365 : vector<8x32xf32>
    %368 = math.exp %367 : vector<8x32xf32>
    %cst_217 = arith.constant 1.000000e+00 : f32
    %369 = vector.broadcast %cst_217 : f32 to vector<8x32xf32>
    %370 = arith.addf %369, %368 : vector<8x32xf32>
    %cst_218 = arith.constant 1.000000e+00 : f32
    %371 = vector.broadcast %cst_218 : f32 to vector<8x32xf32>
    %372 = arith.divf %371, %370 : vector<8x32xf32>
    %c0_219 = arith.constant 0 : index
    %c0_220 = arith.constant 0 : index
    %c0_221 = arith.constant 0 : index
    %373 = vector.load %arg30[%c0_219, %c0_220, %c0_221] : memref<1x8x32xf32, #tpu.memory_space<vmem>>, vector<1x8x32xf32>
    %374 = vector.shape_cast %373 : vector<1x8x32xf32> to vector<8x32xf32>
    %375 = vector.shape_cast %372 : vector<8x32xf32> to vector<1x8x32xf32>
    tpu.vector_store %arg30[%c0_219, %c0_220, %c0_221], %375 {strides = array<i32>} : memref<1x8x32xf32, #tpu.memory_space<vmem>>, vector<1x8x32xf32>,
    return
  }
  func.func @transform_0(%arg0: i32) -> (i32, i32, i32) {
    %c0_i32 = arith.constant 0 : i32
    %c0_i32_0 = arith.constant 0 : i32
    %c0_i32_1 = arith.constant 0 : i32
    return %arg0, %c0_i32, %c0_i32_0 : i32, i32, i32
  }
  func.func @transform_1(%arg0: i32) -> (i32, i32) {
    %c0_i32 = arith.constant 0 : i32
    %c0_i32_0 = arith.constant 0 : i32
    %c0_i32_1 = arith.constant 0 : i32
    return %c0_i32, %c0_i32_0 : i32, i32
  }
  func.func @transform_2(%arg0: i32) -> (i32, i32) {
    %c0_i32 = arith.constant 0 : i32
    %c0_i32_0 = arith.constant 0 : i32
    %c0_i32_1 = arith.constant 0 : i32
    return %c0_i32, %c0_i32_0 : i32, i32
  }
  func.func @transform_3(%arg0: i32) -> (i32, i32) {
    %c0_i32 = arith.constant 0 : i32
    %c0_i32_0 = arith.constant 0 : i32
    %c0_i32_1 = arith.constant 0 : i32
    return %c0_i32, %c0_i32_0 : i32, i32
  }
  func.func @transform_4(%arg0: i32) -> (i32, i32) {
    %c0_i32 = arith.constant 0 : i32
    %c0_i32_0 = arith.constant 0 : i32
    %c0_i32_1 = arith.constant 0 : i32
    return %c0_i32, %c0_i32_0 : i32, i32
  }
  func.func @transform_5(%arg0: i32) -> (i32, i32) {
    %c0_i32 = arith.constant 0 : i32
    %c0_i32_0 = arith.constant 0 : i32
    %c0_i32_1 = arith.constant 0 : i32
    return %c0_i32, %c0_i32_0 : i32, i32
  }
  func.func @transform_6(%arg0: i32) -> (i32, i32) {
    %c0_i32 = arith.constant 0 : i32
    %c0_i32_0 = arith.constant 0 : i32
    %c0_i32_1 = arith.constant 0 : i32
    return %c0_i32, %c0_i32_0 : i32, i32
  }
  func.func @transform_7(%arg0: i32) -> (i32, i32) {
    %c0_i32 = arith.constant 0 : i32
    %c0_i32_0 = arith.constant 0 : i32
    %c0_i32_1 = arith.constant 0 : i32
    return %c0_i32, %c0_i32_0 : i32, i32
  }
  func.func @transform_8(%arg0: i32) -> (i32, i32) {
    %c0_i32 = arith.constant 0 : i32
    %c0_i32_0 = arith.constant 0 : i32
    %c0_i32_1 = arith.constant 0 : i32
    return %c0_i32, %c0_i32_0 : i32, i32
  }
  func.func @transform_9(%arg0: i32) -> (i32, i32) {
    %c0_i32 = arith.constant 0 : i32
    %c0_i32_0 = arith.constant 0 : i32
    %c0_i32_1 = arith.constant 0 : i32
    return %c0_i32, %c0_i32_0 : i32, i32
  }
  func.func @transform_10(%arg0: i32) -> (i32, i32) {
    %c0_i32 = arith.constant 0 : i32
    %c0_i32_0 = arith.constant 0 : i32
    %c0_i32_1 = arith.constant 0 : i32
    return %c0_i32, %c0_i32_0 : i32, i32
  }
  func.func @transform_11(%arg0: i32) -> (i32, i32) {
    %c0_i32 = arith.constant 0 : i32
    %c0_i32_0 = arith.constant 0 : i32
    %c0_i32_1 = arith.constant 0 : i32
    return %c0_i32, %c0_i32_0 : i32, i32
  }
  func.func @transform_12(%arg0: i32) -> (i32, i32) {
    %c0_i32 = arith.constant 0 : i32
    %c0_i32_0 = arith.constant 0 : i32
    %c0_i32_1 = arith.constant 0 : i32
    return %c0_i32, %c0_i32_0 : i32, i32
  }
  func.func @transform_13(%arg0: i32) -> (i32, i32) {
    %c0_i32 = arith.constant 0 : i32
    %c0_i32_0 = arith.constant 0 : i32
    %c0_i32_1 = arith.constant 0 : i32
    return %c0_i32, %c0_i32_0 : i32, i32
  }
  func.func @transform_14(%arg0: i32) -> (i32, i32) {
    %c0_i32 = arith.constant 0 : i32
    %c0_i32_0 = arith.constant 0 : i32
    %c0_i32_1 = arith.constant 0 : i32
    return %c0_i32, %c0_i32_0 : i32, i32
  }
  func.func @transform_15(%arg0: i32) -> (i32, i32) {
    %c0_i32 = arith.constant 0 : i32
    %c0_i32_0 = arith.constant 0 : i32
    %c0_i32_1 = arith.constant 0 : i32
    return %c0_i32, %c0_i32_0 : i32, i32
  }
  func.func @transform_16(%arg0: i32) -> (i32, i32) {
    %c0_i32 = arith.constant 0 : i32
    %c0_i32_0 = arith.constant 0 : i32
    %c0_i32_1 = arith.constant 0 : i32
    return %c0_i32, %c0_i32_0 : i32, i32
  }
  func.func @transform_17(%arg0: i32) -> (i32, i32) {
    %c0_i32 = arith.constant 0 : i32
    %c0_i32_0 = arith.constant 0 : i32
    %c0_i32_1 = arith.constant 0 : i32
    return %c0_i32, %c0_i32_0 : i32, i32
  }
  func.func @transform_18(%arg0: i32) -> (i32, i32) {
    %c0_i32 = arith.constant 0 : i32
    %c0_i32_0 = arith.constant 0 : i32
    %c0_i32_1 = arith.constant 0 : i32
    return %c0_i32, %c0_i32_0 : i32, i32
  }
  func.func @transform_19(%arg0: i32) -> (i32, i32) {
    %c0_i32 = arith.constant 0 : i32
    %c0_i32_0 = arith.constant 0 : i32
    %c0_i32_1 = arith.constant 0 : i32
    return %c0_i32, %c0_i32_0 : i32, i32
  }
  func.func @transform_20(%arg0: i32) -> (i32, i32) {
    %c0_i32 = arith.constant 0 : i32
    %c0_i32_0 = arith.constant 0 : i32
    %c0_i32_1 = arith.constant 0 : i32
    return %c0_i32, %c0_i32_0 : i32, i32
  }
  func.func @transform_21(%arg0: i32) -> (i32, i32) {
    %c0_i32 = arith.constant 0 : i32
    %c0_i32_0 = arith.constant 0 : i32
    %c0_i32_1 = arith.constant 0 : i32
    return %c0_i32, %c0_i32_0 : i32, i32
  }
  func.func @transform_22(%arg0: i32) -> (i32, i32) {
    %c0_i32 = arith.constant 0 : i32
    %c0_i32_0 = arith.constant 0 : i32
    %c0_i32_1 = arith.constant 0 : i32
    return %c0_i32, %c0_i32_0 : i32, i32
  }
  func.func @transform_23(%arg0: i32) -> (i32, i32) {
    %c0_i32 = arith.constant 0 : i32
    %c0_i32_0 = arith.constant 0 : i32
    %c0_i32_1 = arith.constant 0 : i32
    return %c0_i32, %c0_i32_0 : i32, i32
  }
  func.func @transform_24(%arg0: i32) -> (i32, i32) {
    %c0_i32 = arith.constant 0 : i32
    %c0_i32_0 = arith.constant 0 : i32
    %c0_i32_1 = arith.constant 0 : i32
    return %c0_i32, %c0_i32_0 : i32, i32
  }
  func.func @transform_25(%arg0: i32) -> (i32, i32) {
    %c0_i32 = arith.constant 0 : i32
    %c0_i32_0 = arith.constant 0 : i32
    %c0_i32_1 = arith.constant 0 : i32
    return %c0_i32, %c0_i32_0 : i32, i32
  }
  func.func @transform_26(%arg0: i32) -> (i32, i32) {
    %c0_i32 = arith.constant 0 : i32
    %c0_i32_0 = arith.constant 0 : i32
    %c0_i32_1 = arith.constant 0 : i32
    return %c0_i32, %c0_i32_0 : i32, i32
  }
  func.func @transform_27(%arg0: i32) -> (i32, i32) {
    %c0_i32 = arith.constant 0 : i32
    %c0_i32_0 = arith.constant 0 : i32
    %c0_i32_1 = arith.constant 0 : i32
    return %c0_i32, %c0_i32_0 : i32, i32
  }
  func.func @transform_28(%arg0: i32) -> (i32, i32) {
    %c0_i32 = arith.constant 0 : i32
    %c0_i32_0 = arith.constant 0 : i32
    %c0_i32_1 = arith.constant 0 : i32
    return %c0_i32, %c0_i32_0 : i32, i32
  }
  func.func @transform_29(%arg0: i32) -> (i32, i32, i32) {
    %c0_i32 = arith.constant 0 : i32
    %c0_i32_0 = arith.constant 0 : i32
    %c0_i32_1 = arith.constant 0 : i32
    return %arg0, %c0_i32, %c0_i32_0 : i32, i32, i32
  }
  func.func @transform_30(%arg0: i32) -> (i32, i32, i32) {
    %c0_i32 = arith.constant 0 : i32
    %c0_i32_0 = arith.constant 0 : i32
    %c0_i32_1 = arith.constant 0 : i32
    return %arg0, %c0_i32, %c0_i32_0 : i32, i32, i32
  }
}

</mosaic_0001>

<bundles_post_ra>
// kernel: _lambda_.1
= control target key start
LH: loop header
LB: loop body
LE: loop exit
PB: predicated region body
PF: predicated region fallthrough
CT: control target
= control target key end

     0   :  { %s3438_s6 = smov 1   ;;  %s3439_s10 = smov 2   ;;  %s4166_s0 = inlined_call_operand.smem [shape: u32[31], index: -1, kind: input, shape index: {}] }
   0x1   :  { %s3491_s5 = sld [smem:[%s4166_s0]]   ;;  %s3440_s14 = smov 3  }
   0x2   :  { %s3496_s9 = sld [smem:[%s4166_s0 + %s3438_s6]]   ;;  %s3441_s18 = smov 4  }
   0x3   :  { %s3501_s13 = sld [smem:[%s4166_s0 + %s3439_s10]]   ;;  %s3442_s22 = smov 5  }
   0x4   :  { %s3506_s17 = sld [smem:[%s4166_s0 + %s3440_s14]]   ;;  %s3443_s26 = smov 6  }
   0x5   :  { %s3511_s21 = sld [smem:[%s4166_s0 + %s3441_s18]]   ;;  %s3444_s30 = smov 7  }
   0x6   :  { %s3516_s25 = sld [smem:[%s4166_s0 + %s3442_s22]]   ;;  %s3445_s4 = smov 8  }
   0x7   :  { %4185 = sst [smem:[#allocation35_spill]] %s3491_s5  ;;  %s3446_s10 = smov 9  }
   0x8   :  { %4186 = sst [smem:[#allocation36_spill]] %s3496_s9  ;;  %s3447_s15 = smov 10  }
   0x9   :  { %s3521_s29 = sld [smem:[%s4166_s0 + %s3443_s26]]   ;;  %s3448_s20 = smov 11  }
   0xa   :  { %s3526_s3 = sld [smem:[%s4166_s0 + %s3444_s30]]   ;;  %s3449_s26 = smov 12  }
   0xb   :  { %4187 = sst [smem:[#allocation37_spill]] %s3511_s21  ;;  %s3450_s1 = smov 13  }
   0xc   :  { %4188 = sst [smem:[#allocation38_spill]] %s3516_s25  ;;  %s3451_s7 = smov 14  }
   0xd   :  { %s3531_s8 = sld [smem:[%s4166_s0 + %s3445_s4]]   ;;  %s3453_s22 = smov 16  }
   0xe   :  { %s3536_s14 = sld [smem:[%s4166_s0 + %s3446_s10]]   ;;  %s3454_s28 = smov 17  }
   0xf   :  { %4189 = sst [smem:[#allocation39_spill]] %s3521_s29 }
  0x10   :  { %4190 = sst [smem:[#allocation40_spill]] %s3526_s3 }
  0x11   :  { %s3541_s19 = sld [smem:[%s4166_s0 + %s3447_s15]]   ;;  %s3452_s15 = smov 15  }
  0x12   :  { %s3546_s24 = sld [smem:[%s4166_s0 + %s3448_s20]]  }
  0x13   :  { %s3551_s30 = sld [smem:[%s4166_s0 + %s3449_s26]]  }
  0x14   :  { %4191 = sst [smem:[#allocation41_spill]] %s3536_s14 }
  0x15   :  { %s3556_s6 = sld [smem:[%s4166_s0 + %s3450_s1]]  }
  0x16   :  { %s3561_s12 = sld [smem:[%s4166_s0 + %s3451_s7]]   ;;  %s3455_s7 = smov 18  }
  0x17   :  { %4192 = sst [smem:[#allocation42_spill]] %s3541_s19 }
  0x18   :  { %s3566_s20 = sld [smem:[%s4166_s0 + %s3452_s15]]   ;;  %s3456_s15 = smov 19  }
  0x19   :  { %s3571_s27 = sld [smem:[%s4166_s0 + %s3453_s22]]   ;;  %s3457_s22 = smov 20  }
  0x1a   :  { %s3576_s4 = sld [smem:[%s4166_s0 + %s3454_s28]]   ;;  %s3458_s28 = smov 21  }
  0x1b   :  { %s3581_s14 = sld [smem:[%s4166_s0 + %s3455_s7]]   ;;  %s3459_s7 = smov 22  }
  0x1c   :  { %s3586_s3 = sld [smem:[%s4166_s0 + %s3456_s15]]   ;;  %s3460_s15 = smov 23  }
  0x1d   :  { %s3591_s29 = sld [smem:[%s4166_s0 + %s3457_s22]]   ;;  %s3461_s22 = smov 24  }
  0x20   :  { %4193 = sst [smem:[#allocation43_spill]] %s3576_s4 }
  0x21   :  { %4194 = sst [smem:[#allocation44_spill]] %s3581_s14 }
  0x22   :  { %4195 = sst [smem:[#allocation45_spill]] %s3586_s3 }
  0x23   :  { %4196 = sst [smem:[#allocation46_spill]] %s3591_s29 }
  0x24   :  { %s3596_s4 = sld [smem:[%s4166_s0 + %s3458_s28]]   ;;  %s3462_s28 = smov 25  }
  0x25   :  { %s3601_s14 = sld [smem:[%s4166_s0 + %s3459_s7]]   ;;  %s3463_s7 = smov 26  }
  0x26   :  { %s3606_s3 = sld [smem:[%s4166_s0 + %s3460_s15]]   ;;  %s3464_s15 = smov 27  }
  0x27   :  { %s3611_s29 = sld [smem:[%s4166_s0 + %s3461_s22]]   ;;  %s3465_s22 = smov 28  }
  0x28   :  { %s3626_s21 = sld [smem:[%s4166_s0 + %s3464_s15]]  }
  0x29   :  { %s3631_s9 = sld [smem:[%s4166_s0 + %s3465_s22]]  }
  0x2a   :  { %4197 = sst [smem:[#allocation47_spill]] %s3596_s4 }
  0x2b   :  { %4198 = sst [smem:[#allocation48_spill]] %s3601_s14 }
  0x2c   :  { %4199 = sst [smem:[#allocation49_spill]] %s3606_s3 }
  0x2d   :  { %s3616_s4 = sld [smem:[%s4166_s0 + %s3462_s28]]   ;;  %s3466_s28 = smov 29  }
  0x2e   :  { %s3621_s14 = sld [smem:[%s4166_s0 + %s3463_s7]]   ;;  %s3467_s7 = smov 30  }
  0x2f   :  { %4202 = sst [smem:[#allocation52_spill]] %s3631_s9 }
  0x33   :  { %4200 = sst [smem:[#allocation50_spill]] %s3616_s4 }
  0x34   :  { %4201 = sst [smem:[#allocation51_spill]] %s3621_s14 }
  0x35   :  { %s3636_s4 = sld [smem:[%s4166_s0 + %s3466_s28]]  }
  0x36   :  { %s3641_s14 = sld [smem:[%s4166_s0 + %s3467_s7]]  }
  0x3b   :  { %4203 = sst [smem:[#allocation53_spill]] %s3636_s4 }
  0x3c   :  { %67 = vsyncpa [#allocation7], 0 }
  0x3d   :  { %68 = vsyncpa [#allocation10], 0 }
  0x3e   :  { %69 = vsyncpa [#allocation13], 0 }
  0x3f   :  { %70 = vsyncpa [#allocation16], 0 }
  0x40   :  { %71 = vsyncpa [#allocation19], 0 }
  0x41   :  { %72 = vsyncpa [#allocation22], 0 }
  0x42   :  { %73 = vsyncpa [#allocation25], 0 }
  0x43   :  { %74 = vsyncpa [#allocation8], 0 }
  0x44   :  { %76 = vsyncpa [#allocation8 + $0x1], 0  ;;  %s3643_s15 = smov 0   ;;  %s3645_s16 = smov 0  }
  0x45   :  { %s3647_s18 = smov 0   ;;  %s3649_s22 = smov 0  }
  0x46 LB: > { %s4204_s3 = sld [smem:[#allocation49_spill]]  ;;  %s3664_s0 = sadd.s32 4294967295, %s3436_s22   ;;  %s3432_s18 = sphi %s3647_s18, %s4242_s18   ;;  %s3428_s16 = sphi %s3645_s16, %s4244_s16   ;;  %s3424_s15 = sphi %s3643_s15, %s4243_s15   ;;  %s3436_s22 = sphi %s3649_s22, %s4240_s22  }
  0x47   : > { %s4205_s25 = sld [smem:[#allocation38_spill]]  ;;  %s2612_s23 = sadd.s32 4294967294, %s3436_s22  }
  0x48   : > { %s4206_s19 = sld [smem:[#allocation42_spill]]  ;;  %s3668_s26 = sadd.s32 1, %s3436_s22  }
  0x49   : > { %4207 = sst [smem:[#allocation54_spill]] %s3424_s15  ;;  %s729_s28 = sadd.s32 1, %s3432_s18 }
  0x4a   : > { %4208 = sst [smem:[#allocation55_spill]] %s3432_s18  ;;  %s726_s1 = ssub.s32 %s3436_s22, %s3668_s26 }
  0x4b   : > { %4209 = sst [smem:[#allocation56_spill]] %s3436_s22  ;;  %p739_p0 = scmp.ne.s32.totalorder %s3432_s18, %s3428_s16 }
  0x4c   : > { %4210 = sst [smem:[#allocation57_spill]] %s3668_s26  ;;  %p727_p1 = scmp.eq.s32.totalorder %s726_s1, 0 }
  0x4d   : > { %p740_p2 = scmp.eq.s32.totalorder %s3664_s0, 1  ;;  %p745_p3 = scmp.ne.s32.totalorder %s3428_s16, %s3424_s15 }
  0x4e   : > { %p746_p4 = scmp.eq.s32.totalorder %s2612_s23, 1  ;;  %p2613_p7 = scmp.ge.s32.totalorder %s3436_s22, 1 }
  0x4f   : > { %s3679_s2 = scalar_select %p727_p1, %s3432_s18, %s729_s28  }
  0x50   : > { %p3681_p5 = por %p740_p2, %p739_p0  ;;  %p3685_p6 = por %p746_p4, %p745_p3 }
  0x51   : > { %4211 = sst [smem:[#allocation58_spill]] %s3679_s2  ;;  %p753_p8 = scmp.lt.s32.totalorder %s3436_s22, 3 }
  0x52   : > { %s4213_s10 = scalar_select %p3685_p6, 1, 0 }
  0x53   : > { %p2785_p9 = scmp.eq.s32.totalorder %s3664_s0, 0  ;;  %p3692_p10 = pnand %p2613_p7, %p753_p8 }
  0x54   : > { %4214 = sst [smem:[#allocation59_spill]] %s4213_s10  ;;  %s786_s1 = sshll.u32 %s4205_s25, 4  ;;  %s787_s1 = int_to_ptr.hbm [resolvable:$true] %s786_s1 }
  0x55   : > { %p2744_p11 = pneg %p3692_p10  ;;  %s3468_s23 = smov [#allocation9]  }
  0x56   : > { %s788_s28 = sshll.u32 %s3468_s23, 4  ;;  %s819_s2 = sshll.u32 %s4206_s19, 4  ;;  %s789_s28 = int_to_ptr.vmem [resolvable:$true] %s788_s28  ;;  %s3706_s2 = int_to_ptr.hbm [resolvable:$true] %s819_s2 }
  0x57   : > { %p3702_p12 = pnand %p2785_p9, %p2744_p11  ;;  %s3469_s26 = smov [#allocation12]  }
  0x58   : > { %s3708_s10 = sshll.u32 %s3469_s26, 4  ;;  %s2986_s15 = sshra.s32 %s787_s1, 4  ;;  %s2987_s15 = int_to_ptr.hbm [resolvable:$true] %s2986_s15  ;;  %s822_s10 = int_to_ptr.vmem [resolvable:$true] %s3708_s10 }
  0x59   : > { %s2988_s22 = scalar_lea.hbm %s2987_s15, 1  ;;  %p3712_p0 = pneg %p3702_p12 }
  0x5a   : > { %p2989_p13 = scmp.ne.s32.totalorder %s2987_s15, %s2988_s22  ;;  %s2993_s4 = scalar_lea.hbm %s4205_s25, 1 }
  0x5b   : > { %p2994_p3 = scmp.lt.s32.totalorder %s2987_s15, %s4205_s25  ;;  %p2995_p4 = scmp.lt.s32.totalorder %s2993_s4, %s2988_s22 }
  0x5c   : > { %p2991_p1 = pnand %p3712_p0, %p2989_p13 }
  0x5d   : > { %p2996_p7 = por %p2995_p4, %p2994_p3 }
  0x5e   : > { %p2992_p2 = pneg %p2991_p1 }
  0x60   : > { %p2997_p8 = pnand %p2996_p7, %p2992_p2 }
  0x62   : > { %3000 = shalt.err (!%p2997_p8)
}
  0x63   : > { %2750 = dma.hbm_to_vmem [thread:$0]  (!%p3702_p12), %s787_s1, 16, %s789_s28, [#allocation10]  }
  0x64   : > { %s3016_s26 = sshra.s32 %s3706_s2, 4  ;;  %s3023_s4 = scalar_lea.hbm %s4206_s19, 1  ;;  %s3017_s26 = int_to_ptr.hbm [resolvable:$true] %s3016_s26 }
  0x65   : > { %s3018_s9 = scalar_lea.hbm %s3017_s26, 1  ;;  %p3024_p3 = scmp.lt.s32.totalorder %s3017_s26, %s4206_s19 }
  0x66   : > { %p3019_p11 = scmp.ne.s32.totalorder %s3017_s26, %s3018_s9  ;;  %p3025_p2 = scmp.lt.s32.totalorder %s3023_s4, %s3018_s9 }
  0x68   : > { %p3021_p13 = pnand %p3019_p11, %p3712_p0  ;;  %p3026_p4 = por %p3025_p2, %p3024_p3 }
  0x6a   : > { %p3022_p1 = pneg %p3021_p13 }
  0x6c   : > { %p3027_p7 = pnand %p3026_p4, %p3022_p1 }
  0x6e   : > { %3030 = shalt.err (!%p3027_p7)
}
  0x6f   : > { %2756 = dma.hbm_to_vmem [thread:$0]  (!%p3702_p12), %s3706_s2, 16, %s822_s10, [#allocation13]  }
  0x70   : > { %s844_s15 = sshll.u32 %s3551_s30, 4  ;;  %s3470_s22 = smov [#allocation15]   ;;  %s845_s15 = int_to_ptr.hbm [resolvable:$true] %s844_s15 }
  0x71   : > { %s846_s1 = sshll.u32 %s3470_s22, 4  ;;  %s872_s28 = sshll.u32 %s3561_s12, 4  ;;  %s847_s1 = int_to_ptr.vmem [resolvable:$true] %s846_s1  ;;  %s873_s28 = int_to_ptr.hbm [resolvable:$true] %s872_s28 }
  0x72   : > { %s3046_s26 = sshra.s32 %s845_s15, 4  ;;  %s3053_s4 = scalar_lea.hbm %s3551_s30, 24  ;;  %s3047_s26 = int_to_ptr.hbm [resolvable:$true] %s3046_s26 }
  0x73   : > { %s3048_s9 = scalar_lea.hbm %s3047_s26, 24  ;;  %p3054_p1 = scmp.lt.s32.totalorder %s3047_s26, %s3551_s30 }
  0x74   : > { %p3049_p8 = scmp.ne.s32.totalorder %s3047_s26, %s3048_s9  ;;  %p3055_p3 = scmp.lt.s32.totalorder %s3053_s4, %s3048_s9 }
  0x76   : > { %p3051_p11 = pnand %p3049_p8, %p3712_p0  ;;  %p3056_p2 = por %p3055_p3, %p3054_p1 }
  0x78   : > { %p3052_p13 = pneg %p3051_p11 }
  0x7a   : > { %p3057_p4 = pnand %p3056_p2, %p3052_p13 }
  0x7c   : > { %3060 = shalt.err (!%p3057_p4)
}
  0x7d   : > { %s3471_s2 = smov 128   ;;  %s3472_s10 = smov 8  }
  0x7e   : > { %2762 = dma.hbm_to_vmem [thread:$0]  (!%p3702_p12), %s845_s15, 384, %s847_s1, [#allocation16], %s3471_s2, %s3471_s2, %s3472_s10  }
  0x7f   : > { %s3473_s22 = smov [#allocation18]   ;;  %s900_s26 = sshll.u32 %s3571_s27, 4  ;;  %s3743_s26 = int_to_ptr.hbm [resolvable:$true] %s900_s26 }
  0x80   : > { %s874_s19 = sshll.u32 %s3473_s22, 4  ;;  %s3076_s9 = sshra.s32 %s873_s28, 4  ;;  %s875_s19 = int_to_ptr.vmem [resolvable:$true] %s874_s19  ;;  %s3077_s9 = int_to_ptr.hbm [resolvable:$true] %s3076_s9 }
  0x81   : > { %s3078_s4 = scalar_lea.hbm %s3077_s9, 24  ;;  %s3083_s25 = scalar_lea.hbm %s3561_s12, 24 }
  0x82   : > { %p3079_p7 = scmp.ne.s32.totalorder %s3077_s9, %s3078_s4  ;;  %p3084_p13 = scmp.lt.s32.totalorder %s3077_s9, %s3561_s12 }
  0x83   : > { %p3085_p1 = scmp.lt.s32.totalorder %s3083_s25, %s3078_s4 }
  0x84   : > { %p3081_p8 = pnand %p3079_p7, %p3712_p0 }
  0x85   : > { %p3086_p3 = por %p3085_p1, %p3084_p13 }
  0x86   : > { %p3082_p11 = pneg %p3081_p8 }
  0x88   : > { %p3087_p2 = pnand %p3086_p3, %p3082_p11 }
  0x8a   : > { %3090 = shalt.err (!%p3087_p2)
}
  0x8b   : > { %2768 = dma.hbm_to_vmem [thread:$0]  (!%p3702_p12), %s873_s28, 384, %s875_s19, [#allocation19], %s3471_s2, %s3471_s2, %s3472_s10  }
  0x8c   : > { %s771_s15 = sshll.u32 %s3506_s17, 4  ;;  %s3474_s1 = smov [#allocation21]   ;;  %s3755_s15 = int_to_ptr.hbm [resolvable:$true] %s771_s15 }
  0x8d   : > { %s902_s22 = sshll.u32 %s3474_s1, 4  ;;  %s3106_s25 = sshra.s32 %s3743_s26, 4  ;;  %s903_s22 = int_to_ptr.vmem [resolvable:$true] %s902_s22  ;;  %s3107_s25 = int_to_ptr.hbm [resolvable:$true] %s3106_s25 }
  0x8e   : > { %s3108_s9 = scalar_lea.hbm %s3107_s25, 24  ;;  %s3113_s4 = scalar_lea.hbm %s3571_s27, 24 }
  0x8f   : > { %p3109_p4 = scmp.ne.s32.totalorder %s3107_s25, %s3108_s9  ;;  %p3114_p11 = scmp.lt.s32.totalorder %s3107_s25, %s3571_s27 }
  0x90   : > { %p3115_p13 = scmp.lt.s32.totalorder %s3113_s4, %s3108_s9 }
  0x91   : > { %p3111_p7 = pnand %p3109_p4, %p3712_p0 }
  0x92   : > { %p3116_p1 = por %p3115_p13, %p3114_p11 }
  0x93   : > { %p3112_p8 = pneg %p3111_p7 }
  0x95   : > { %p3117_p3 = pnand %p3116_p1, %p3112_p8 }
  0x97   : > { %3120 = shalt.err (!%p3117_p3)
}
  0x98   : > { %2774 = dma.hbm_to_vmem [thread:$0]  (!%p3702_p12), %s3743_s26, 384, %s903_s22, [#allocation22], %s3471_s2, %s3471_s2, %s3472_s10  }
  0x99   : > { %s3475_s19 = smov [#allocation6]   ;;  %s804_s1 = sshll.u32 %s3531_s8, 4  ;;  %s3769_s1 = int_to_ptr.hbm [resolvable:$true] %s804_s1 }
  0x9a   : > { %s773_s28 = sshll.u32 %s3475_s19, 4  ;;  %s3136_s25 = sshra.s32 %s3755_s15, 4  ;;  %s774_s28 = int_to_ptr.vmem [resolvable:$true] %s773_s28  ;;  %s3137_s25 = int_to_ptr.hbm [resolvable:$true] %s3136_s25 }
  0x9b   : > { %s3138_s9 = scalar_lea.hbm %s3137_s25, 1  ;;  %s3143_s4 = scalar_lea.hbm %s3506_s17, 1 }
  0x9c   : > { %p3139_p2 = scmp.ne.s32.totalorder %s3137_s25, %s3138_s9  ;;  %p3144_p8 = scmp.lt.s32.totalorder %s3137_s25, %s3506_s17 }
  0x9d   : > { %p3145_p11 = scmp.lt.s32.totalorder %s3143_s4, %s3138_s9 }
  0x9e   : > { %p3141_p4 = pnand %p3139_p2, %p3712_p0 }
  0x9f   : > { %p3146_p13 = por %p3145_p11, %p3144_p8 }
  0xa0   : > { %p3142_p7 = pneg %p3141_p4 }
  0xa2   : > { %p3147_p1 = pnand %p3146_p13, %p3142_p7 }
  0xa4   : > { %3150 = shalt.err (!%p3147_p1)
}
  0xa5   : > { %2747 = dma.hbm_to_vmem [thread:$0]  (!%p3702_p12), %s3755_s15, 16, %s774_s28, [#allocation7]  }
  0xa6   : > { %s830_s26 = sshll.u32 %s3546_s24, 4  ;;  %s3476_s22 = smov [#allocation11]   ;;  %s3780_s26 = int_to_ptr.hbm [resolvable:$true] %s830_s26 }
  0xa7   : > { %s806_s19 = sshll.u32 %s3476_s22, 4  ;;  %s3166_s25 = sshra.s32 %s3769_s1, 4  ;;  %s807_s19 = int_to_ptr.vmem [resolvable:$true] %s806_s19  ;;  %s3167_s25 = int_to_ptr.hbm [resolvable:$true] %s3166_s25 }
  0xa8   : > { %s3168_s9 = scalar_lea.hbm %s3167_s25, 1  ;;  %s3173_s4 = scalar_lea.hbm %s3531_s8, 1 }
  0xa9   : > { %p3169_p3 = scmp.ne.s32.totalorder %s3167_s25, %s3168_s9  ;;  %p3174_p7 = scmp.lt.s32.totalorder %s3167_s25, %s3531_s8 }
  0xaa   : > { %p3175_p8 = scmp.lt.s32.totalorder %s3173_s4, %s3168_s9 }
  0xab   : > { %p3171_p2 = pnand %p3169_p3, %p3712_p0 }
  0xac   : > { %p3176_p11 = por %p3175_p8, %p3174_p7 }
  0xad   : > { %p3172_p4 = pneg %p3171_p2 }
  0xaf   : > { %p3177_p13 = pnand %p3176_p11, %p3172_p4 }
  0xb1   : > { %3180 = shalt.err (!%p3177_p13)
}
  0xb2   : > { %2753 = dma.hbm_to_vmem [thread:$0]  (!%p3702_p12), %s3769_s1, 16, %s807_s19, [#allocation10]  }
  0xb3   : > { %s3477_s15 = smov [#allocation14]   ;;  %s858_s22 = sshll.u32 %s3556_s6, 4  ;;  %s3791_s22 = int_to_ptr.hbm [resolvable:$true] %s858_s22 }
  0xb4   : > { %s832_s28 = sshll.u32 %s3477_s15, 4  ;;  %s3196_s25 = sshra.s32 %s3780_s26, 4  ;;  %s833_s28 = int_to_ptr.vmem [resolvable:$true] %s832_s28  ;;  %s3197_s25 = int_to_ptr.hbm [resolvable:$true] %s3196_s25 }
  0xb5   : > { %s3198_s9 = scalar_lea.hbm %s3197_s25, 24  ;;  %s3203_s4 = scalar_lea.hbm %s3546_s24, 24 }
  0xb6   : > { %p3199_p1 = scmp.ne.s32.totalorder %s3197_s25, %s3198_s9  ;;  %p3204_p4 = scmp.lt.s32.totalorder %s3197_s25, %s3546_s24 }
  0xb7   : > { %p3205_p7 = scmp.lt.s32.totalorder %s3203_s4, %s3198_s9 }
  0xb8   : > { %p3201_p3 = pnand %p3199_p1, %p3712_p0 }
  0xb9   : > { %p3206_p8 = por %p3205_p7, %p3204_p4 }
  0xba   : > { %p3202_p2 = pneg %p3201_p3 }
  0xbc   : > { %p3207_p11 = pnand %p3206_p8, %p3202_p2 }
  0xbe   : > { %3210 = shalt.err (!%p3207_p11)
}
  0xbf   : > { %2759 = dma.hbm_to_vmem [thread:$0]  (!%p3702_p12), %s3780_s26, 384, %s833_s28, [#allocation13], %s3471_s2, %s3471_s2, %s3472_s10  }
  0xc0   : > { %s886_s1 = sshll.u32 %s3566_s20, 4  ;;  %s3478_s19 = smov [#allocation17]   ;;  %s3805_s1 = int_to_ptr.hbm [resolvable:$true] %s886_s1 }
  0xc1   : > { %s860_s15 = sshll.u32 %s3478_s19, 4  ;;  %s3226_s25 = sshra.s32 %s3791_s22, 4  ;;  %s861_s15 = int_to_ptr.vmem [resolvable:$true] %s860_s15  ;;  %s3227_s25 = int_to_ptr.hbm [resolvable:$true] %s3226_s25 }
  0xc2   : > { %s3228_s9 = scalar_lea.hbm %s3227_s25, 24  ;;  %s3233_s4 = scalar_lea.hbm %s3556_s6, 24 }
  0xc3   : > { %p3229_p13 = scmp.ne.s32.totalorder %s3227_s25, %s3228_s9  ;;  %p3234_p2 = scmp.lt.s32.totalorder %s3227_s25, %s3556_s6 }
  0xc4   : > { %p3235_p4 = scmp.lt.s32.totalorder %s3233_s4, %s3228_s9 }
  0xc5   : > { %p3231_p1 = pnand %p3229_p13, %p3712_p0 }
  0xc6   : > { %p3236_p7 = por %p3235_p4, %p3234_p2 }
  0xc7   : > { %p3232_p3 = pneg %p3231_p1 }
  0xc9   : > { %p3237_p8 = pnand %p3236_p7, %p3232_p3 }
  0xcb   : > { %3240 = shalt.err (!%p3237_p8)
}
  0xcc   : > { %2765 = dma.hbm_to_vmem [thread:$0]  (!%p3702_p12), %s3791_s22, 384, %s861_s15, [#allocation16], %s3471_s2, %s3471_s2, %s3472_s10  }
  0xcd   : > { %s3479_s26 = smov [#allocation20]   ;;  %s932_s19 = sshll.u32 %s4204_s3, 4  ;;  %s3819_s19 = int_to_ptr.hbm [resolvable:$true] %s932_s19 }
  0xce   : > { %s888_s28 = sshll.u32 %s3479_s26, 4  ;;  %s3256_s25 = sshra.s32 %s3805_s1, 4  ;;  %s889_s28 = int_to_ptr.vmem [resolvable:$true] %s888_s28  ;;  %s3257_s25 = int_to_ptr.hbm [resolvable:$true] %s3256_s25 }
  0xcf   : > { %s3258_s9 = scalar_lea.hbm %s3257_s25, 24  ;;  %s3263_s4 = scalar_lea.hbm %s3566_s20, 24 }
  0xd0   : > { %p3259_p11 = scmp.ne.s32.totalorder %s3257_s25, %s3258_s9  ;;  %p3264_p3 = scmp.lt.s32.totalorder %s3257_s25, %s3566_s20 }
  0xd1   : > { %p3265_p2 = scmp.lt.s32.totalorder %s3263_s4, %s3258_s9 }
  0xd2   : > { %p3261_p13 = pnand %p3259_p11, %p3712_p0 }
  0xd3   : > { %p3266_p4 = por %p3265_p2, %p3264_p3 }
  0xd4   : > { %p3262_p1 = pneg %p3261_p13 }
  0xd6   : > { %p3267_p7 = pnand %p3266_p4, %p3262_p1 }
  0xd8   : > { %3270 = shalt.err (!%p3267_p7)
}
  0xd9   : > { %2771 = dma.hbm_to_vmem [thread:$0]  (!%p3702_p12), %s3805_s1, 384, %s889_s28, [#allocation19], %s3471_s2, %s3471_s2, %s3472_s10  }
  0xda   : > { %s946_s22 = sshll.u32 %s3611_s29, 4  ;;  %s3480_s15 = smov [#allocation23]   ;;  %s3833_s22 = int_to_ptr.hbm [resolvable:$true] %s946_s22 }
  0xdb   : > { %s934_s26 = sshll.u32 %s3480_s15, 4  ;;  %s3286_s25 = sshra.s32 %s3819_s19, 4  ;;  %s935_s26 = int_to_ptr.vmem [resolvable:$true] %s934_s26  ;;  %s3287_s25 = int_to_ptr.hbm [resolvable:$true] %s3286_s25 }
  0xdc   : > { %s3288_s9 = scalar_lea.hbm %s3287_s25, 24  ;;  %s3293_s4 = scalar_lea.hbm %s4204_s3, 24 }
  0xdd   : > { %p3289_p8 = scmp.ne.s32.totalorder %s3287_s25, %s3288_s9  ;;  %p3294_p1 = scmp.lt.s32.totalorder %s3287_s25, %s4204_s3 }
  0xde   : > { %p3295_p3 = scmp.lt.s32.totalorder %s3293_s4, %s3288_s9 }
  0xdf   : > { %p3291_p11 = pnand %p3289_p8, %p3712_p0 }
  0xe0   : > { %p3296_p2 = por %p3295_p3, %p3294_p1 }
  0xe1   : > { %p3292_p13 = pneg %p3291_p11 }
  0xe3   : > { %p3297_p4 = pnand %p3296_p2, %p3292_p13 }
  0xe5   : > { %3300 = shalt.err (!%p3297_p4)
}
  0xe6   : > { %2777 = dma.hbm_to_vmem [thread:$0]  (!%p3702_p12), %s3819_s19, 384, %s935_s26, [#allocation22], %s3471_s2, %s3471_s2, %s3472_s10  }
  0xe7   : > { %s3481_s1 = smov [#allocation24]   ;;  %s3316_s15 = sshra.s32 %s3833_s22, 4  ;;  %s3317_s15 = int_to_ptr.hbm [resolvable:$true] %s3316_s15 }
  0xe8   : > { %s948_s28 = sshll.u32 %s3481_s1, 4  ;;  %s3318_s25 = scalar_lea.hbm %s3317_s15, 24  ;;  %s949_s28 = int_to_ptr.vmem [resolvable:$true] %s948_s28 }
  0xe9   : > { %p3319_p7 = scmp.ne.s32.totalorder %s3317_s15, %s3318_s25  ;;  %s3323_s9 = scalar_lea.hbm %s3611_s29, 24 }
  0xea   : > { %p3324_p13 = scmp.lt.s32.totalorder %s3317_s15, %s3611_s29  ;;  %p3325_p1 = scmp.lt.s32.totalorder %s3323_s9, %s3318_s25 }
  0xeb   : > { %p3321_p8 = pnand %p3319_p7, %p3712_p0 }
  0xec   : > { %p3326_p3 = por %p3325_p1, %p3324_p13 }
  0xed   : > { %p3322_p11 = pneg %p3321_p8 }
  0xef   : > { %p3327_p2 = pnand %p3326_p3, %p3322_p11 }
  0xf1   : > { %3330 = shalt.err (!%p3327_p2)
}
  0xf2   : > { %2780 = dma.hbm_to_vmem [thread:$0]  (!%p3702_p12), %s3833_s22, 384, %s949_s28, [#allocation25], %s3471_s2, %s3471_s2, %s3472_s10  }
  0xf3   : > { %983 = sbr.rel (%p3692_p10) target bundleno = 2745 (0xab9), region = 136 }
  0xf8   : > { %3391 = dma.done.wait (%p2785_p9), [#allocation7], 16  }
  0xf9   : > { %3393 = vsyncadd (%p2785_p9), [#allocation7], 4294967280 }
  0xfa   : > { %3395 = dma.done.wait (%p2785_p9), [#allocation10], 32  }
  0xfb   : > { %3397 = vsyncadd (%p2785_p9), [#allocation10], 4294967264 }
  0xfc   : > { %3399 = dma.done.wait (%p2785_p9), [#allocation13], 400  }
  0xfd   : > { %3401 = vsyncadd (%p2785_p9), [#allocation13], 4294966896 }
  0xfe   : > { %3403 = dma.done.wait (%p2785_p9), [#allocation16], 768  }
  0xff   : > { %3405 = vsyncadd (%p2785_p9), [#allocation16], 4294966528 }
 0x100   : > { %3407 = dma.done.wait (%p2785_p9), [#allocation19], 768  }
 0x101   : > { %3409 = vsyncadd (%p2785_p9), [#allocation19], 4294966528 }
 0x102   : > { %3411 = dma.done.wait (%p2785_p9), [#allocation22], 768  }
 0x103   : > { %3413 = vsyncadd (%p2785_p9), [#allocation22], 4294966528 }
 0x104   : > { %3415 = dma.done.wait (%p2785_p9), [#allocation25], 384  }
 0x105   : > { %3417 = vsyncadd (%p2785_p9), [#allocation25], 4294966912  ;;  %s4218_s5 = sld [smem:[#allocation35_spill]]  ;;  %p1120_p10 = scmp.lt.s32.totalorder %s3664_s0, 1  ;;  %v1161_v0 = vlaneseq  ;;  %vm1169_vm1 = vcmask 64512   ;;  %v3482_v5 = vmov 0.0  }
 0x106   : > { %s4219_s18 = sld [smem:[#allocation36_spill]]  ;;  %v1196_v7 = vld [vmem:[%s3501_s13 + $0x18] sm:$0xff]  ;;  %v1195_v8 = vld [vmem:[%s3501_s13 + $0x10] sm:$0xff]  ;;  %v1194_v10 = vld [vmem:[%s3501_s13 + $0x8] sm:$0xff]  ;;  %vm1137_vm2 = vcmask 261120   ;;  %vm1239_vm3 = vcmask 1043456  }
 0x107   : > { %s3889_s23 = scalar_select %p1120_p10, %s3664_s0, 1  ;;  %v1162_v1 = vshrl.u32 %v1161_v0, 7  ;;  %v1164_v2 = vand.u32 127, %v1161_v0  ;;  %1212 = vmatpush.msra.mxu2 %v1196_v7  ;;  %v1193_v12 = vld [vmem:[%s3501_s13] sm:$0xff]  ;;  %vm1235_vm4 = vcmask 228352   ;;  %v1384_v40 = vld [vmem:[#allocation14 + $0x10] sm:$0xff] }
 0x108   : > { %s4221_s19 = sld [smem:[#allocation37_spill]]  ;;  %v2887_v27 = vld [vmem:[#allocation6] ss:$0 sm:$0xff]  ;;  %v1387_v41 = vld [vmem:[#allocation15 + $0x10] sm:$0xff]  ;;  %v1390_v42 = vld [vmem:[#allocation17 + $0x10] sm:$0xff]  ;;  %vm1358_vm6 = vcmask 195584  }
 0x109   : > { %s4181_s2 = sshll.u32 %s3889_s23, 3  ;;  %v1165_v3 = vsub.s32 %v1162_v1, %v1164_v2  ;;  %s4222_s22 = sld [smem:[#allocation39_spill]]  ;;  %1213 = vmatpush.msra.mxu2 %v1195_v8  ;;  %v1383_v44 = vld [vmem:[#allocation14 + $0x8] sm:$0xff]  ;;  %v1386_v45 = vld [vmem:[#allocation15 + $0x8] sm:$0xff]  ;;  %v1389_v46 = vld [vmem:[#allocation17 + $0x8] sm:$0xff]  ;;  %vm1563_vm8 = vcmask 188416  }
 0x10a   : > { %s4224_s4 = sld [smem:[#allocation40_spill]]  ;;  %v1382_v48 = vld [vmem:[#allocation14] sm:$0xff]  ;;  %v1385_v49 = vld [vmem:[#allocation15] sm:$0xff]  ;;  %v1388_v50 = vld [vmem:[#allocation17] sm:$0xff] }
 0x10b   : > { %s1123_s10 = scalar_lea.vmem %s4218_s5, %s4181_s2  ;;  %vm1166_vm0 = vcmp.eq.s32.totalorder %v1165_v3, 1  ;;  %1214 = vmatpush.msra.mxu2 %v1194_v10  ;;  %s4225_s1 = sld [smem:[#allocation41_spill]]  ;;  %v3933_v51 = vld [vmem:[#allocation18 + $0x10] sm:$0xff]  ;;  %v3935_v52 = vld [vmem:[#allocation20 + $0x10] sm:$0xff]  ;;  %v3941_v54 = vld [vmem:[#allocation20 + $0x8] sm:$0xff] }
 0x10c   : > { %s4220_s11 = smov %s4219_s18  ;;  %v1128_v4 = vld [vmem:[%s1123_s10] sm:$0xff]  ;;  %v3896_v6 = vsel %vm1166_vm0, 1.0, %v3482_v5  ;;  %v1132_v9 = vld [vmem:[%s4219_s18 + $0x18] sm:$0xff]  ;;  %v3943_v55 = vld [vmem:[#allocation18] sm:$0xff]  ;;  %s4226_s28 = sld [smem:[#allocation43_spill]] }
 0x10d   : > { %1188 = vmatpush.msra.mxu1 %v1128_v4  ;;  %v1131_v11 = vld [vmem:[%s4220_s11 + $0x10] sm:$0xff]  ;;  %1153 = vmatpush.msra.mxu0 %v1132_v9  ;;  %v1130_v13 = vld [vmem:[%s4220_s11 + $0x8] sm:$0xff]  ;;  %v1129_v14 = vld [vmem:[%s4220_s11] sm:$0xff]  ;;  %s4227_s15 = sld [smem:[#allocation44_spill]]  ;;  %s3366_s5 = scalar_lea.hbm %s3641_s14, 16 }
 0x10e   : > { %2645 = vmatmul.msk.f32.vlgmr.msra.gmra.mxu1 %vm1169_vm1, %v3896_v6  ;;  %1215 = vmatpush.msra.mxu2 %v1193_v12  ;;  %v1230_v16 = vld [vmem:[%s4221_s19 + $0x18] sm:$0xf]  ;;  %v1229_v18 = vld [vmem:[%s4221_s19 + $0x10] sm:$0xff]  ;;  %v1228_v20 = vld [vmem:[%s4221_s19 + $0x8] sm:$0xff]  ;;  %s4228_s25 = sld [smem:[#allocation45_spill]] }
 0x10f   : > { %s4223_s26 = smov %s4222_s22  ;;  %1154 = vmatpush.msra.mxu0 %v1131_v11  ;;  %v1266_v17 = vld [vmem:[%s4222_s22 + $0x18] sm:$0xf]  ;;  %2648 = vmatpush.msk.msra.mxu3 %vm1239_vm3, %v1230_v16  ;;  %v1227_v22 = vld [vmem:[%s4221_s19] sm:$0xff]  ;;  %v3945_v56 = vld [vmem:[#allocation20] sm:$0xff]  ;;  %s4229_s9 = sld [smem:[#allocation47_spill]] }
 0x110   : > { %2650 = vmatpush.msk.msrb.mxu1 %vm1239_vm3, %v1266_v17  ;;  %v1265_v19 = vld [vmem:[%s4223_s26 + $0x10] sm:$0xff]  ;;  %v1264_v21 = vld [vmem:[%s4223_s26 + $0x8] sm:$0xff]  ;;  %v1263_v23 = vld [vmem:[%s4223_s26] sm:$0xff]  ;;  %s4230_s18 = sld [smem:[#allocation46_spill]]  ;;  %s1117_s22 = sand.u32 1, %s3428_s16  }
 0x111   : > { %1155 = vmatpush.msra.mxu0 %v1130_v13  ;;  %1256 = vmatpush.msra.mxu3 %v1229_v18  ;;  %v1317_v24 = vld [vmem:[%s4224_s4 + $0x18] sm:$0xf]  ;;  %v1316_v25 = vld [vmem:[%s4224_s4 + $0x10] sm:$0xff]  ;;  %v1315_v26 = vld [vmem:[%s4224_s4 + $0x8] sm:$0xff]  ;;  %s4231_s10 = sld [smem:[#allocation48_spill]] }
 0x112   : > { %1287 = vmatpush.msrb.mxu1 %v1265_v19  ;;  %2653 = vmatpush.msk.msrb.mxu2 %vm1239_vm3, %v1317_v24  ;;  %v1314_v37 = vld [vmem:[%s4224_s4] sm:$0xff]  ;;  %v1353_v39 = vld [vmem:[%s4225_s1 + $0x10] sm:$0xff]  ;;  %v1352_v43 = vld [vmem:[%s4225_s1 + $0x8] sm:$0xff] }
 0x113   : > { %1156 = vmatpush.msra.mxu0 %v1129_v14  ;;  %1257 = vmatpush.msra.mxu3 %v1228_v20  ;;  %v1351_v47 = vld [vmem:[%s4225_s1] sm:$0xff]  ;;  %v3937_v53 = vld [vmem:[#allocation18 + $0x8] sm:$0xff]  ;;  %v3954_v57 = vld [vmem:[#allocation21 + $0x10] sm:$0xff]  ;;  %s2364_s1 = scalar_lea.sflag [#allocation8], %s1117_s22 }
 0x114   : > { %2643 = vmatmul.msk.f32.vlgmr.msra.gmra.mxu0 %vm1137_vm2, %v1128_v4  ;;  %1288 = vmatpush.msrb.mxu1 %v1264_v21  ;;  %v3956_v58 = vld [vmem:[#allocation21 + $0x8] sm:$0xff]  ;;  %v2888_v59 = vld [vmem:[#allocation11] ss:$0 sm:$0xff]  ;;  %v2891_v9 = vld [vmem:[%s4227_s15] ss:$0 sm:$0xff]  ;;  %s4105_s15 = sshll.u32 %s1117_s22, 3 }
 0x115   : > { %1258 = vmatpush.msra.mxu3 %v1227_v22  ;;  %1337 = vmatpush.msrb.mxu2 %v1316_v25  ;;  %v3959_v60 = vld [vmem:[#allocation21] sm:$0xff] }
 0x116   : > { %1289 = vmatpush.msrb.mxu1 %v1263_v23  ;;  %v2893_v14 = vld [vmem:[%s4228_s25] ss:$0 sm:$0xff]  ;;  %s1119_s25 = scalar_lea.vmem [#allocation26], %s4105_s15 }
 0x117   : > { %1338 = vmatpush.msrb.mxu2 %v1315_v26  ;;  %1375 = vmatpush.msrb.mxu3 %v1353_v39  ;;  %v4001_v17 = vld [vmem:[%s4229_s9] sm:$0x1]  ;;  %s4233_s9 = sld [smem:[#allocation50_spill]] }
 0x118   : > { %1422 = vmatpush.msra.mxu1 %v1384_v40  ;;  %v4006_v22 = vld [vmem:[%s4230_s18] sm:$0x1]  ;;  %s2691_s18 = sshll.u32 %s3664_s0, 3 }
 0x119   : > { %1339 = vmatpush.msrb.mxu2 %v1314_v37  ;;  %1376 = vmatpush.msrb.mxu3 %v1352_v43 }
 0x11a   : > { %1423 = vmatpush.msra.mxu1 %v1383_v44 }
 0x11b   : > { %1377 = vmatpush.msrb.mxu3 %v1351_v47 }
 0x11c   : > { %1424 = vmatpush.msra.mxu1 %v1382_v48 }
 0x18b   : > { %v1190_v15 = vpop.f32.mrf.mxu1 }
 0x18c   : > { %2646 = vmatmul.msk.f32.vlgmr.msra.gmra.mxu2 %vm1137_vm2, %v1190_v15 }
 0x18d   : > { %1470 = vmatpush.msra.mxu2 %v1390_v42 }
 0x18f   : > { %1471 = vmatpush.msra.mxu2 %v1389_v46 }
 0x191   : > { %v1158_v28 = vpop.f32.mrf.mxu0  ;;  %1472 = vmatpush.msra.mxu2 %v1388_v50 }
 0x192   : > { %v1159_v29 = vadd.f32 %v2887_v27, %v1158_v28 }
 0x20f   : > { %v1217_v30 = vpop.f32.mrf.mxu2 }
 0x210   : > { %v1220_v31 = vadd.f32 %v1217_v30, %v1159_v29 }
 0x212   : > { %v1222_v32 = vmin.f32 %v1220_v31, 0.0  ;;  %vm1221_vm5 = vcmp.gt.f32.partialorder %v1220_v31, 0.0 }
 0x214   : > { %v1223_v33 = vmul.f32 1.442695, %v1222_v32 }
 0x216   : > { %2896 = vpow2.f32 %v1223_v33 }
 0x21c   : > { %v2897_v34 = vpop.eup %2896 }
 0x21d   : > { %v2647_v35 = vadd.f32 -1.0, %v2897_v34 }
 0x21f   : > { %v1226_v36 = vsel %vm1221_vm5, %v1220_v31, %v2647_v35  ;;  %v4010_v35 = vld [vmem:[%s4231_s10] sm:$0x1]  ;;  %s2377_s10 = scalar_lea.hbm %s3641_s14, %s2691_s18 }
 0x220   : > { %2649 = vmatmul.msk.f32.vlgmr.msra.gmra.mxu3 %vm1235_vm4, %v1226_v36  ;;  %2651 = vmatmul.msk.f32.vlgmr.msrb.gmra.mxu1 %vm1235_vm4, %v1226_v36  ;;  %s2381_s2 = sshll.u32 %s2377_s10, 4  ;;  %s2382_s2 = int_to_ptr.hbm [resolvable:$true] %s2381_s2 }
 0x221   : > { %1309 = vmatpush.msrb.mxu0 %v1226_v36  ;;  %1494 = vmatpush.msra.mxu3 %v3933_v51  ;;  %s3360_s3 = sshra.s32 %s2382_s2, 4  ;;  %s3361_s3 = int_to_ptr.hbm [resolvable:$true] %s3360_s3 }
 0x222   : > { %2652 = vmatmul.msk.f32.vlgmr.msrb.gmra.mxu0 %vm1169_vm1, %v3896_v6  ;;  %1514 = vmatpush.msrb.mxu1 %v3935_v52  ;;  %s3362_s4 = scalar_lea.hbm %s3361_s3, 8  ;;  %p3367_p4 = scmp.lt.s32.totalorder %s3361_s3, %s3641_s14 }
 0x223   : > { %1446 = vmatpush.msra.mxu0 %v1387_v41  ;;  %1495 = vmatpush.msra.mxu3 %v3937_v53  ;;  %p3363_p9 = scmp.ne.s32.totalorder %s3361_s3, %s3362_s4  ;;  %p3368_p7 = scmp.lt.s32.totalorder %s3366_s5, %s3362_s4 }
 0x224   : > { %1515 = vmatpush.msrb.mxu1 %v3941_v54 }
 0x225   : > { %1447 = vmatpush.msra.mxu0 %v1386_v45  ;;  %1496 = vmatpush.msra.mxu3 %v3943_v55  ;;  %p3364_p12 = pnand %p3363_p9, %p3681_p5  ;;  %p3369_p8 = por %p3368_p7, %p3367_p4 }
 0x226   : > { %1516 = vmatpush.msrb.mxu1 %v3945_v56 }
 0x227   : > { %1448 = vmatpush.msra.mxu0 %v1385_v49  ;;  %p3365_p0 = pneg %p3364_p12 }
 0x229   : > { %1534 = vmatpush.msrb.mxu0 %v3954_v57  ;;  %p3370_p11 = pnand %p3369_p8, %p3365_p0 }
 0x22b   : > { %1535 = vmatpush.msrb.mxu0 %v3956_v58 }
 0x22d   : > { %1536 = vmatpush.msrb.mxu0 %v3959_v60 }
 0x29d   : > { %v1291_v61 = vpop.f32.mrf.mxu1 }
 0x29e   : > { %v1292_v62 = vadd.f32 %v2888_v59, %v1291_v61 }
 0x29f   : > { %v1311_v38 = vpop.f32.mrf.mxu0 }
 0x2a0   : > { %2654 = vmatmul.msk.f32.vlgmr.msrb.gmra.mxu2 %vm1235_vm4, %v1311_v38 }
 0x2a1   : > { %1581 = vmatpush.msrb.mxu2 %v3933_v51 }
 0x2a3   : > { %1582 = vmatpush.msrb.mxu2 %v3937_v53  ;;  %v3992_v8 = vpop.f32.mrf.mxu3 }
 0x2a5   : > { %1583 = vmatpush.msrb.mxu2 %v3943_v55 }
 0x323   : > { %v1341_v63 = vpop.f32.mrf.mxu2 }
 0x324   : > { %v1344_v0 = vadd.f32 %v1341_v63, %v1292_v62 }
 0x326   : > { %v1346_v1 = vmin.f32 %v1344_v0, 0.0  ;;  %vm1345_vm7 = vcmp.gt.f32.partialorder %v1344_v0, 0.0 }
 0x328   : > { %v1347_v2 = vmul.f32 1.442695, %v1346_v1 }
 0x32a   : > { %2898 = vpow2.f32 %v1347_v2 }
 0x330   : > { %v2899_v3 = vpop.eup %2898 }
 0x331   : > { %v2655_v4 = vadd.f32 -1.0, %v2899_v3 }
 0x333   : > { %v1350_v7 = vsel %vm1345_vm7, %v1344_v0, %v2655_v4 }
 0x334   : > { %2656 = vmatmul.msk.f32.vlgmr.msrb.gmra.mxu3 %vm1358_vm6, %v1350_v7  ;;  %2657 = vmatmul.msk.f32.vlgmr.msra.gmra.mxu1 %vm1358_vm6, %v1350_v7 }
 0x335   : > { %2658 = vmatmul.msk.f32.vlgmr.msra.gmra.mxu0 %vm1358_vm6, %v1350_v7  ;;  %2659 = vmatmul.msk.f32.vlgmr.msra.gmra.mxu2 %vm1358_vm6, %v1350_v7 }
 0x336   : > { %1601 = vmatpush.msrb.mxu3 %v3935_v52  ;;  %1621 = vmatpush.msra.mxu1 %v3954_v57 }
 0x337   : > { %1667 = vmatpush.msra.mxu0 %v3933_v51  ;;  %1687 = vmatpush.msra.mxu2 %v3935_v52 }
 0x338   : > { %1602 = vmatpush.msrb.mxu3 %v3941_v54  ;;  %1622 = vmatpush.msra.mxu1 %v3956_v58 }
 0x339   : > { %1668 = vmatpush.msra.mxu0 %v3937_v53  ;;  %1688 = vmatpush.msra.mxu2 %v3941_v54 }
 0x33a   : > { %1603 = vmatpush.msrb.mxu3 %v3945_v56  ;;  %1623 = vmatpush.msra.mxu1 %v3959_v60 }
 0x33b   : > { %1669 = vmatpush.msra.mxu0 %v3943_v55  ;;  %1689 = vmatpush.msra.mxu2 %v3945_v56 }
 0x33c   : > { %1497 = vmatmul.f32.vlgmr.msra.gmra.mxu3 %v3482_v5  ;;  %1517 = vmatmul.f32.vlgmr.msrb.gmra.mxu1 %v3482_v5 }
 0x33d   : > { %1537 = vmatmul.f32.vlgmr.msrb.gmra.mxu0 %v3482_v5  ;;  %1707 = vmatpush.msra.mxu3 %v3954_v57  ;;  %v2890_v5 = vld [vmem:[%s4226_s28] ss:$0 sm:$0xff]  ;;  %s4232_s28 = sld [smem:[#allocation51_spill]] }
 0x33e   : > { %1753 = vmatpush.msrb.mxu1 %v3933_v51  ;;  %1773 = vmatpush.msrb.mxu0 %v3935_v52 }
 0x33f   : > { %1708 = vmatpush.msra.mxu3 %v3956_v58 }
 0x340   : > { %1754 = vmatpush.msrb.mxu1 %v3937_v53  ;;  %1774 = vmatpush.msrb.mxu0 %v3941_v54 }
 0x341   : > { %1709 = vmatpush.msra.mxu3 %v3959_v60 }
 0x342   : > { %1755 = vmatpush.msrb.mxu1 %v3943_v55  ;;  %1775 = vmatpush.msrb.mxu0 %v3945_v56 }
 0x3b1   : > { %v1426_v10 = vpop.f32.mrf.mxu1 }
 0x3b2   : > { %v1427_v11 = vadd.f32 %v2890_v5, %v1426_v10  ;;  %v1450_v12 = vpop.f32.mrf.mxu0 }
 0x3b3   : > { %v1451_v13 = vadd.f32 %v2891_v9, %v1450_v12 }
 0x3b4   : > { %1429 = vst.msk [vmem:[#allocation2] sm:$0xff] %vm1358_vm6, %v1427_v11 }
 0x3b5   : > { %1453 = vst.msk [vmem:[#allocation3] sm:$0xff] %vm1358_vm6, %v1451_v13 }
 0x3b7   : > { %v3998_v15 = vpop.f32.mrf.mxu3 }
 0x3b8   : > { %v1474_v16 = vpop.f32.mrf.mxu2 }
 0x3b9   : > { %v1475_v18 = vadd.f32 %v2893_v14, %v1474_v16  ;;  %v1518_v19 = vpop.f32.mrf.mxu1 }
 0x3ba   : > { %v1519_v20 = vadd.f32 %v1518_v19, %v4001_v17  ;;  %v1538_v36 = vpop.f32.mrf.mxu0 }
 0x3bb   : > { %1477 = vst.msk [vmem:[#allocation4] sm:$0xff] %vm1358_vm6, %v1475_v18  ;;  %v1541_v26 = vld [vmem:[#allocation2] sm:$0x1]  ;;  %v1539_v38 = vadd.f32 %v1538_v36, %v4010_v35  ;;  %v1628_v62 = vld [vmem:[#allocation2 + $0x1] sm:$0x1] }
 0x3bc   : > { %v1548_v21 = vld [vmem:[#allocation3] sm:$0x1]  ;;  %v1635_v63 = vld [vmem:[#allocation3 + $0x1] sm:$0x1]  ;;  %v1721_v36 = vld [vmem:[#allocation3 + $0x2] sm:$0x1] }
 0x3bd   : > { %v1549_v23 = vadd.f32 %v1548_v21, %v1519_v20 }
 0x3bf   : > { %v1498_v24 = vpop.f32.mrf.mxu3  ;;  %v1550_v28 = vsub.f32 0.0, %v1549_v23 }
 0x3c0   : > { %v1499_v25 = vadd.f32 %v1498_v24, %v4006_v22 }
 0x3c1   : > { %v1551_v31 = vmul.f32 1.442695, %v1550_v28 }
 0x3c2   : > { %v1542_v27 = vadd.f32 %v1541_v26, %v1499_v25  ;;  %v1555_v41 = vld [vmem:[#allocation4] sm:$0x1]  ;;  %v1642_v18 = vld [vmem:[#allocation4 + $0x1] sm:$0x1] }
 0x3c4   : > { %v1543_v29 = vsub.f32 0.0, %v1542_v27 }
 0x3c6   : > { %v1544_v30 = vmul.f32 1.442695, %v1543_v29  ;;  %v1714_v29 = vld [vmem:[#allocation2 + $0x2] sm:$0x1] }
 0x3c8   : > { %2900 = vpow2.f32 %v1544_v30 }
 0x3c9   : > { %2902 = vpow2.f32 %v1551_v31 }
 0x3ce   : > { %v2901_v32 = vpop.eup %2900 }
 0x3cf   : > { %v1546_v33 = vadd.f32 1.0, %v2901_v32  ;;  %v2903_v34 = vpop.eup %2902 }
 0x3d0   : > { %v1553_v37 = vadd.f32 1.0, %v2903_v34 }
 0x3d1   : > { %2904 = vrcp.f32 %v1546_v33 }
 0x3d2   : > { %2906 = vrcp.f32 %v1553_v37 }
 0x3d7   : > { %v2905_v39 = vpop.eup %2904 }
 0x3d8   : > { %v1556_v40 = vmul.f32 %v2905_v39, %v1539_v38  ;;  %v2907_v43 = vpop.eup %2906 }
 0x3d9   : > { %v1559_v44 = vsub.f32 1.0, %v2907_v43  ;;  %v1561_v46 = vmul.f32 0.0, %v2907_v43 }
 0x3da   : > { %v1557_v42 = vadd.f32 %v1556_v40, %v1555_v41 }
 0x3dc   : > { %2908 = vtanh.f32 %v1557_v42 }
 0x3e2   : > { %v2909_v45 = vpop.eup %2908 }
 0x3e3   : > { %v1560_v47 = vmul.f32 %v2909_v45, %v1559_v44 }
 0x3e5   : > { %v1562_v48 = vadd.f32 %v1561_v46, %v1560_v47 }
 0x3e7   : > { %1564 = vst.msk [vmem:[#allocation5] sm:$0x1] %vm1563_vm8, %v1562_v48  ;;  %2660 = vmatmul.msk.f32.vlgmr.msrb.gmra.mxu2 %vm1358_vm6, %v1562_v48  ;;  %2661 = vmatmul.msk.f32.vlgmr.msrb.gmra.mxu3 %vm1358_vm6, %v1562_v48 }
 0x3e8   : > { %2662 = vmatmul.msk.f32.vlgmr.msra.gmra.mxu1 %vm1358_vm6, %v1562_v48  ;;  %1793 = vmatpush.msrb.mxu2 %v3954_v57 }
 0x3e9   : > { %1839 = vmatpush.msrb.mxu3 %v3933_v51  ;;  %1859 = vmatpush.msra.mxu1 %v3935_v52 }
 0x3ea   : > { %1794 = vmatpush.msrb.mxu2 %v3956_v58 }
 0x3eb   : > { %1840 = vmatpush.msrb.mxu3 %v3937_v53  ;;  %1860 = vmatpush.msra.mxu1 %v3941_v54 }
 0x3ec   : > { %1795 = vmatpush.msrb.mxu2 %v3959_v60 }
 0x3ed   : > { %1841 = vmatpush.msrb.mxu3 %v3943_v55  ;;  %1861 = vmatpush.msra.mxu1 %v3945_v56 }
 0x465   : > { %v1625_v11 = vpop.f32.mrf.mxu1 }
 0x466   : > { %v1626_v13 = vadd.f32 %v1625_v11, %v4010_v35 }
 0x46a   : > { %v1585_v49 = vpop.f32.mrf.mxu2  ;;  %v1605_v50 = vpop.f32.mrf.mxu3 }
 0x46b   : > { %v1586_v59 = vadd.f32 %v1585_v49, %v4006_v22  ;;  %v1606_v61 = vadd.f32 %v1605_v50, %v4001_v17 }
 0x46d   : > { %v1629_v0 = vadd.f32 %v1628_v62, %v1586_v59  ;;  %v1636_v1 = vadd.f32 %v1635_v63, %v1606_v61 }
 0x46f   : > { %v1630_v2 = vsub.f32 0.0, %v1629_v0  ;;  %v1637_v3 = vsub.f32 0.0, %v1636_v1 }
 0x471   : > { %v1631_v4 = vmul.f32 1.442695, %v1630_v2  ;;  %v1638_v7 = vmul.f32 1.442695, %v1637_v3 }
 0x473   : > { %2910 = vpow2.f32 %v1631_v4 }
 0x474   : > { %2912 = vpow2.f32 %v1638_v7  ;;  %v1800_v7 = vld [vmem:[#allocation2 + $0x3] sm:$0x1] }
 0x479   : > { %v2911_v5 = vpop.eup %2910 }
 0x47a   : > { %v1633_v9 = vadd.f32 1.0, %v2911_v5  ;;  %v2913_v10 = vpop.eup %2912  ;;  %v1807_v5 = vld [vmem:[#allocation3 + $0x3] sm:$0x1] }
 0x47b   : > { %v1640_v12 = vadd.f32 1.0, %v2913_v10 }
 0x47c   : > { %2914 = vrcp.f32 %v1633_v9 }
 0x47d   : > { %2916 = vrcp.f32 %v1640_v12 }
 0x482   : > { %v2915_v14 = vpop.eup %2914 }
 0x483   : > { %v1643_v16 = vmul.f32 %v2915_v14, %v1626_v13  ;;  %v2917_v20 = vpop.eup %2916 }
 0x484   : > { %v1646_v21 = vsub.f32 1.0, %v2917_v20  ;;  %v1648_v24 = vmul.f32 %v2917_v20, %v1562_v48  ;;  %v1728_v48 = vld [vmem:[#allocation4 + $0x2] sm:$0x1] }
 0x485   : > { %v1644_v19 = vadd.f32 %v1643_v16, %v1642_v18 }
 0x487   : > { %2918 = vtanh.f32 %v1644_v19 }
 0x48d   : > { %v2919_v23 = vpop.eup %2918 }
 0x48e   : > { %v1647_v25 = vmul.f32 %v2919_v23, %v1646_v21 }
 0x490   : > { %v1649_v26 = vadd.f32 %v1648_v24, %v1647_v25 }
 0x492   : > { %1650 = vst.msk [vmem:[#allocation5 + $0x1] sm:$0x1] %vm1563_vm8, %v1649_v26  ;;  %2663 = vmatmul.msk.f32.vlgmr.msra.gmra.mxu0 %vm1358_vm6, %v1649_v26  ;;  %2664 = vmatmul.msk.f32.vlgmr.msra.gmra.mxu2 %vm1358_vm6, %v1649_v26 }
 0x493   : > { %2665 = vmatmul.msk.f32.vlgmr.msra.gmra.mxu3 %vm1358_vm6, %v1649_v26  ;;  %1879 = vmatpush.msra.mxu0 %v3954_v57 }
 0x494   : > { %1925 = vmatpush.msra.mxu2 %v3933_v51  ;;  %1945 = vmatpush.msra.mxu3 %v3935_v52 }
 0x495   : > { %1880 = vmatpush.msra.mxu0 %v3956_v58 }
 0x496   : > { %1926 = vmatpush.msra.mxu2 %v3937_v53  ;;  %1946 = vmatpush.msra.mxu3 %v3941_v54 }
 0x497   : > { %1881 = vmatpush.msra.mxu0 %v3959_v60 }
 0x498   : > { %1927 = vmatpush.msra.mxu2 %v3943_v55  ;;  %1947 = vmatpush.msra.mxu3 %v3945_v56 }
 0x50f   : > { %v1671_v27 = vpop.f32.mrf.mxu0 }
 0x510   : > { %v1672_v28 = vadd.f32 %v1671_v27, %v4006_v22 }
 0x512   : > { %v1715_v30 = vadd.f32 %v1714_v29, %v1672_v28 }
 0x514   : > { %v1716_v31 = vsub.f32 0.0, %v1715_v30 }
 0x515   : > { %v1691_v32 = vpop.f32.mrf.mxu2 }
 0x516   : > { %v1717_v33 = vmul.f32 1.442695, %v1716_v31  ;;  %v1692_v34 = vadd.f32 %v1691_v32, %v4001_v17  ;;  %v1711_v42 = vpop.f32.mrf.mxu3 }
 0x517   : > { %v1712_v45 = vadd.f32 %v1711_v42, %v4010_v35 }
 0x518   : > { %2920 = vpow2.f32 %v1717_v33  ;;  %v1722_v37 = vadd.f32 %v1721_v36, %v1692_v34 }
 0x51a   : > { %v1723_v38 = vsub.f32 0.0, %v1722_v37  ;;  %v1893_v37 = vld [vmem:[#allocation3 + $0x4] sm:$0x1] }
 0x51c   : > { %v1724_v39 = vmul.f32 1.442695, %v1723_v38 }
 0x51e   : > { %v2921_v40 = vpop.eup %2920  ;;  %2922 = vpow2.f32 %v1724_v39  ;;  %v1886_v39 = vld [vmem:[#allocation2 + $0x4] sm:$0x1] }
 0x51f   : > { %v1719_v41 = vadd.f32 1.0, %v2921_v40 }
 0x521   : > { %2924 = vrcp.f32 %v1719_v41 }
 0x524   : > { %v2923_v43 = vpop.eup %2922 }
 0x525   : > { %v1726_v44 = vadd.f32 1.0, %v2923_v43 }
 0x527   : > { %v2925_v46 = vpop.eup %2924  ;;  %2926 = vrcp.f32 %v1726_v44 }
 0x528   : > { %v1729_v47 = vmul.f32 %v2925_v46, %v1712_v45 }
 0x52a   : > { %v1730_v49 = vadd.f32 %v1729_v47, %v1728_v48 }
 0x52c   : > { %2928 = vtanh.f32 %v1730_v49  ;;  %v1900_v49 = vld [vmem:[#allocation4 + $0x4] sm:$0x1] }
 0x52d   : > { %v2927_v50 = vpop.eup %2926 }
 0x52e   : > { %v1732_v59 = vsub.f32 1.0, %v2927_v50  ;;  %v1734_v62 = vmul.f32 %v2927_v50, %v1649_v26  ;;  %v1814_v26 = vld [vmem:[#allocation4 + $0x3] sm:$0x1] }
 0x532   : > { %v2929_v61 = vpop.eup %2928 }
 0x533   : > { %v1733_v63 = vmul.f32 %v2929_v61, %v1732_v59 }
 0x535   : > { %v1735_v0 = vadd.f32 %v1734_v62, %v1733_v63 }
 0x537   : > { %1736 = vst.msk [vmem:[#allocation5 + $0x2] sm:$0x1] %vm1563_vm8, %v1735_v0  ;;  %2666 = vmatmul.msk.f32.vlgmr.msrb.gmra.mxu1 %vm1358_vm6, %v1735_v0  ;;  %2667 = vmatmul.msk.f32.vlgmr.msrb.gmra.mxu0 %vm1358_vm6, %v1735_v0 }
 0x538   : > { %2668 = vmatmul.msk.f32.vlgmr.msrb.gmra.mxu2 %vm1358_vm6, %v1735_v0  ;;  %1965 = vmatpush.msrb.mxu1 %v3954_v57 }
 0x539   : > { %2011 = vmatpush.msrb.mxu0 %v3933_v51  ;;  %2031 = vmatpush.msrb.mxu2 %v3935_v52 }
 0x53a   : > { %1966 = vmatpush.msrb.mxu1 %v3956_v58 }
 0x53b   : > { %2012 = vmatpush.msrb.mxu0 %v3937_v53  ;;  %2032 = vmatpush.msrb.mxu2 %v3941_v54 }
 0x53c   : > { %1967 = vmatpush.msrb.mxu1 %v3959_v60 }
 0x53d   : > { %2013 = vmatpush.msrb.mxu0 %v3943_v55  ;;  %2033 = vmatpush.msrb.mxu2 %v3945_v56 }
 0x5b4   : > { %v1757_v1 = vpop.f32.mrf.mxu1  ;;  %v1777_v2 = vpop.f32.mrf.mxu0 }
 0x5b5   : > { %v1758_v3 = vadd.f32 %v1757_v1, %v4006_v22  ;;  %v1778_v4 = vadd.f32 %v1777_v2, %v4001_v17 }
 0x5b7   : > { %v1801_v9 = vadd.f32 %v1800_v7, %v1758_v3  ;;  %v1808_v10 = vadd.f32 %v1807_v5, %v1778_v4  ;;  %v1972_v5 = vld [vmem:[#allocation2 + $0x5] sm:$0x1] }
 0x5b9   : > { %v1802_v11 = vsub.f32 0.0, %v1801_v9  ;;  %v1809_v12 = vsub.f32 0.0, %v1808_v10  ;;  %v1979_v9 = vld [vmem:[#allocation3 + $0x5] sm:$0x1] }
 0x5bb   : > { %v1803_v13 = vmul.f32 1.442695, %v1802_v11  ;;  %v1810_v14 = vmul.f32 1.442695, %v1809_v12  ;;  %v1797_v20 = vpop.f32.mrf.mxu2 }
 0x5bc   : > { %v1798_v23 = vadd.f32 %v1797_v20, %v4010_v35 }
 0x5bd   : > { %2930 = vpow2.f32 %v1803_v13 }
 0x5be   : > { %2932 = vpow2.f32 %v1810_v14 }
 0x5c3   : > { %v2931_v16 = vpop.eup %2930 }
 0x5c4   : > { %v1805_v18 = vadd.f32 1.0, %v2931_v16  ;;  %v2933_v19 = vpop.eup %2932 }
 0x5c5   : > { %v1812_v21 = vadd.f32 1.0, %v2933_v19 }
 0x5c6   : > { %2934 = vrcp.f32 %v1805_v18 }
 0x5c7   : > { %2936 = vrcp.f32 %v1812_v21 }
 0x5cc   : > { %v2935_v24 = vpop.eup %2934 }
 0x5cd   : > { %v1815_v25 = vmul.f32 %v2935_v24, %v1798_v23  ;;  %v2937_v28 = vpop.eup %2936  ;;  %v1986_v24 = vld [vmem:[#allocation4 + $0x5] sm:$0x1] }
 0x5ce   : > { %v1818_v29 = vsub.f32 1.0, %v2937_v28  ;;  %v1820_v31 = vmul.f32 %v2937_v28, %v1735_v0 }
 0x5cf   : > { %v1816_v27 = vadd.f32 %v1815_v25, %v1814_v26 }
 0x5d1   : > { %2938 = vtanh.f32 %v1816_v27 }
 0x5d7   : > { %v2939_v30 = vpop.eup %2938 }
 0x5d8   : > { %v1819_v32 = vmul.f32 %v2939_v30, %v1818_v29 }
 0x5da   : > { %v1821_v33 = vadd.f32 %v1820_v31, %v1819_v32 }
 0x5dc   : > { %1822 = vst.msk [vmem:[#allocation5 + $0x3] sm:$0x1] %vm1563_vm8, %v1821_v33  ;;  %2669 = vmatmul.msk.f32.vlgmr.msrb.gmra.mxu3 %vm1358_vm6, %v1821_v33  ;;  %2670 = vmatmul.msk.f32.vlgmr.msra.gmra.mxu1 %vm1358_vm6, %v1821_v33 }
 0x5dd   : > { %2671 = vmatmul.msk.f32.vlgmr.msra.gmra.mxu0 %vm1358_vm6, %v1821_v33  ;;  %2051 = vmatpush.msrb.mxu3 %v3954_v57 }
 0x5de   : > { %2097 = vmatpush.msra.mxu1 %v3933_v51  ;;  %2117 = vmatpush.msra.mxu0 %v3935_v52 }
 0x5df   : > { %2052 = vmatpush.msrb.mxu3 %v3956_v58 }
 0x5e0   : > { %2098 = vmatpush.msra.mxu1 %v3937_v53  ;;  %2118 = vmatpush.msra.mxu0 %v3941_v54 }
 0x5e1   : > { %2053 = vmatpush.msrb.mxu3 %v3959_v60 }
 0x5e2   : > { %2099 = vmatpush.msra.mxu1 %v3943_v55  ;;  %2119 = vmatpush.msra.mxu0 %v3945_v56 }
 0x659   : > { %v1863_v34 = vpop.f32.mrf.mxu1 }
 0x65a   : > { %v1864_v36 = vadd.f32 %v1863_v34, %v4001_v17  ;;  %v1883_v56 = vpop.f32.mrf.mxu0  ;;  %v2058_v34 = vld [vmem:[#allocation2 + $0x6] sm:$0x1] }
 0x65b   : > { %v1884_v46 = vadd.f32 %v1883_v56, %v4010_v35 }
 0x65c   : > { %v1894_v38 = vadd.f32 %v1893_v37, %v1864_v36 }
 0x65e   : > { %v1895_v41 = vsub.f32 0.0, %v1894_v38 }
 0x65f   : > { %v1843_v51 = vpop.f32.mrf.mxu3 }
 0x660   : > { %v1844_v52 = vadd.f32 %v1843_v51, %v4006_v22  ;;  %v1896_v54 = vmul.f32 1.442695, %v1895_v41 }
 0x662   : > { %v1887_v40 = vadd.f32 %v1886_v39, %v1844_v52  ;;  %v2065_v39 = vld [vmem:[#allocation3 + $0x6] sm:$0x1] }
 0x664   : > { %v1888_v53 = vsub.f32 0.0, %v1887_v40 }
 0x666   : > { %v1889_v42 = vmul.f32 1.442695, %v1888_v53 }
 0x668   : > { %2940 = vpow2.f32 %v1889_v42 }
 0x669   : > { %2942 = vpow2.f32 %v1896_v54 }
 0x66e   : > { %v2941_v43 = vpop.eup %2940 }
 0x66f   : > { %v1891_v55 = vadd.f32 1.0, %v2941_v43  ;;  %v2943_v44 = vpop.eup %2942 }
 0x670   : > { %v1898_v45 = vadd.f32 1.0, %v2943_v44 }
 0x671   : > { %2944 = vrcp.f32 %v1891_v55 }
 0x672   : > { %2946 = vrcp.f32 %v1898_v45 }
 0x677   : > { %v2945_v47 = vpop.eup %2944 }
 0x678   : > { %v1901_v48 = vmul.f32 %v2945_v47, %v1884_v46  ;;  %v2947_v59 = vpop.eup %2946  ;;  %v2072_v47 = vld [vmem:[#allocation4 + $0x6] sm:$0x1] }
 0x679   : > { %v1904_v61 = vsub.f32 1.0, %v2947_v59  ;;  %v1906_v63 = vmul.f32 %v2947_v59, %v1821_v33 }
 0x67a   : > { %v1902_v50 = vadd.f32 %v1901_v48, %v1900_v49 }
 0x67c   : > { %2948 = vtanh.f32 %v1902_v50 }
 0x682   : > { %v2949_v62 = vpop.eup %2948 }
 0x683   : > { %v1905_v0 = vmul.f32 %v2949_v62, %v1904_v61 }
 0x685   : > { %v1907_v1 = vadd.f32 %v1906_v63, %v1905_v0 }
 0x687   : > { %1908 = vst.msk [vmem:[#allocation5 + $0x4] sm:$0x1] %vm1563_vm8, %v1907_v1  ;;  %2672 = vmatmul.msk.f32.vlgmr.msra.gmra.mxu2 %vm1358_vm6, %v1907_v1  ;;  %2673 = vmatmul.msk.f32.vlgmr.msra.gmra.mxu3 %vm1358_vm6, %v1907_v1 }
 0x688   : > { %2674 = vmatmul.msk.f32.vlgmr.msrb.gmra.mxu1 %vm1358_vm6, %v1907_v1  ;;  %2137 = vmatpush.msra.mxu2 %v3954_v57 }
 0x68a   : > { %2138 = vmatpush.msra.mxu2 %v3956_v58 }
 0x68c   : > { %2139 = vmatpush.msra.mxu2 %v3959_v60 }
 0x705   : > { %v1969_v60 = vpop.f32.mrf.mxu1 }
 0x706   : > { %v1970_v20 = vadd.f32 %v1969_v60, %v4010_v35  ;;  %v2221_v60 = vld [vmem:[#allocation24 + $0x8] sm:$0xff] }
 0x70a   : > { %v1929_v2 = vpop.f32.mrf.mxu2  ;;  %v1949_v3 = vpop.f32.mrf.mxu3 }
 0x70b   : > { %v1930_v4 = vadd.f32 %v1929_v2, %v4006_v22  ;;  %v1950_v7 = vadd.f32 %v1949_v3, %v4001_v17 }
 0x70d   : > { %v1973_v10 = vadd.f32 %v1972_v5, %v1930_v4  ;;  %v1980_v11 = vadd.f32 %v1979_v9, %v1950_v7  ;;  %v2144_v4 = vld [vmem:[#allocation2 + $0x7] sm:$0x1]  ;;  %v2151_v7 = vld [vmem:[#allocation3 + $0x7] sm:$0x1] }
 0x70f   : > { %v1974_v12 = vsub.f32 0.0, %v1973_v10  ;;  %v1981_v13 = vsub.f32 0.0, %v1980_v11 }
 0x711   : > { %v1975_v14 = vmul.f32 1.442695, %v1974_v12  ;;  %v1982_v16 = vmul.f32 1.442695, %v1981_v13 }
 0x713   : > { %2950 = vpow2.f32 %v1975_v14  ;;  %v2172_v14 = vld [vmem:[#allocation23 + $0x10] sm:$0xff] }
 0x714   : > { %2952 = vpow2.f32 %v1982_v16  ;;  %v2171_v16 = vld [vmem:[#allocation23 + $0x8] sm:$0xff]  ;;  %2193 = vmatpush.msra.mxu3 %v2172_v14 }
 0x716   : > { %2194 = vmatpush.msra.mxu3 %v2171_v16 }
 0x719   : > { %v2951_v57 = vpop.eup %2950 }
 0x71a   : > { %v1977_v58 = vadd.f32 1.0, %v2951_v57  ;;  %v2953_v18 = vpop.eup %2952  ;;  %v2170_v57 = vld [vmem:[#allocation23] sm:$0xff] }
 0x71b   : > { %v1984_v19 = vadd.f32 1.0, %v2953_v18  ;;  %2195 = vmatpush.msra.mxu3 %v2170_v57 }
 0x71c   : > { %2954 = vrcp.f32 %v1977_v58 }
 0x71d   : > { %2956 = vrcp.f32 %v1984_v19 }
 0x722   : > { %v2955_v21 = vpop.eup %2954 }
 0x723   : > { %v1987_v23 = vmul.f32 %v2955_v21, %v1970_v20  ;;  %v2957_v26 = vpop.eup %2956 }
 0x724   : > { %v1990_v27 = vsub.f32 1.0, %v2957_v26  ;;  %v1992_v29 = vmul.f32 %v2957_v26, %v1907_v1 }
 0x725   : > { %v1988_v25 = vadd.f32 %v1987_v23, %v1986_v24 }
 0x727   : > { %2958 = vtanh.f32 %v1988_v25  ;;  %v2158_v25 = vld [vmem:[#allocation4 + $0x7] sm:$0x1] }
 0x72d   : > { %v2959_v28 = vpop.eup %2958 }
 0x72e   : > { %v1991_v30 = vmul.f32 %v2959_v28, %v1990_v27 }
 0x730   : > { %v1993_v31 = vadd.f32 %v1992_v29, %v1991_v30 }
 0x732   : > { %1994 = vst.msk [vmem:[#allocation5 + $0x5] sm:$0x1] %vm1563_vm8, %v1993_v31  ;;  %2675 = vmatmul.msk.f32.vlgmr.msrb.gmra.mxu0 %vm1358_vm6, %v1993_v31  ;;  %2676 = vmatmul.msk.f32.vlgmr.msrb.gmra.mxu2 %vm1358_vm6, %v1993_v31 }
 0x733   : > { %2677 = vmatmul.msk.f32.vlgmr.msrb.gmra.mxu3 %vm1358_vm6, %v1993_v31 }
 0x7af   : > { %v2015_v32 = vpop.f32.mrf.mxu0 }
 0x7b0   : > { %v2016_v33 = vadd.f32 %v2015_v32, %v4006_v22 }
 0x7b2   : > { %v2059_v36 = vadd.f32 %v2058_v34, %v2016_v33  ;;  %v2892_v33 = vld [vmem:[#allocation12] ss:$0 sm:$0xff] }
 0x7b4   : > { %v2060_v37 = vsub.f32 0.0, %v2059_v36 }
 0x7b5   : > { %v2035_v38 = vpop.f32.mrf.mxu2 }
 0x7b6   : > { %v2061_v51 = vmul.f32 1.442695, %v2060_v37  ;;  %v2036_v52 = vadd.f32 %v2035_v38, %v4001_v17  ;;  %v2055_v43 = vpop.f32.mrf.mxu3  ;;  %v2220_v37 = vld [vmem:[#allocation24] sm:$0xff] }
 0x7b7   : > { %v2056_v56 = vadd.f32 %v2055_v43, %v4010_v35 }
 0x7b8   : > { %2960 = vpow2.f32 %v2061_v51  ;;  %v2066_v40 = vadd.f32 %v2065_v39, %v2036_v52  ;;  %v2256_v51 = vld [vmem:[%s4232_s28 + $0x10] sm:$0xff]  ;;  %v2255_v52 = vld [vmem:[%s4232_s28 + $0x8] sm:$0xff]  ;;  %v2254_v39 = vld [vmem:[%s4232_s28] sm:$0xff] }
 0x7ba   : > { %v2067_v41 = vsub.f32 0.0, %v2066_v40  ;;  %v2311_v40 = vld [vmem:[%s3626_s21 + $0x18] sm:$0xf] }
 0x7bc   : > { %v2068_v53 = vmul.f32 1.442695, %v2067_v41  ;;  %v2310_v41 = vld [vmem:[%s3626_s21 + $0x10] sm:$0xff] }
 0x7be   : > { %v2961_v42 = vpop.eup %2960  ;;  %2962 = vpow2.f32 %v2068_v53  ;;  %v2309_v53 = vld [vmem:[%s3626_s21 + $0x8] sm:$0xff] }
 0x7bf   : > { %v2063_v54 = vadd.f32 1.0, %v2961_v42  ;;  %v2894_v42 = vld [vmem:[%s4233_s9] ss:$0 sm:$0xff]  ;;  %s2379_s9 = sshll.u32 %s1119_s25, 4  ;;  %s2380_s9 = int_to_ptr.vmem [resolvable:$true] %s2379_s9 }
 0x7c1   : > { %2964 = vrcp.f32 %v2063_v54 }
 0x7c4   : > { %v2963_v55 = vpop.eup %2962 }
 0x7c5   : > { %v2070_v44 = vadd.f32 1.0, %v2963_v55 }
 0x7c7   : > { %v2965_v45 = vpop.eup %2964  ;;  %2966 = vrcp.f32 %v2070_v44 }
 0x7c8   : > { %v2073_v46 = vmul.f32 %v2965_v45, %v2056_v56 }
 0x7ca   : > { %v2074_v48 = vadd.f32 %v2073_v46, %v2072_v47  ;;  %v2889_v46 = vld [vmem:[#allocation9] ss:$0 sm:$0xff] }
 0x7cc   : > { %2968 = vtanh.f32 %v2074_v48 }
 0x7cd   : > { %v2967_v49 = vpop.eup %2966 }
 0x7ce   : > { %v2076_v50 = vsub.f32 1.0, %v2967_v49  ;;  %v2078_v61 = vmul.f32 %v2967_v49, %v1993_v31  ;;  %v1261_v49 = vadd.f32 %v2889_v46, %v3992_v8 }
 0x7d2   : > { %v2969_v59 = vpop.eup %2968 }
 0x7d3   : > { %v2077_v62 = vmul.f32 %v2969_v59, %v2076_v50 }
 0x7d5   : > { %v2079_v63 = vadd.f32 %v2078_v61, %v2077_v62  ;;  %v2308_v61 = vld [vmem:[%s3626_s21] sm:$0xff] }
 0x7d7   : > { %2080 = vst.msk [vmem:[#allocation5 + $0x6] sm:$0x1] %vm1563_vm8, %v2079_v63  ;;  %2678 = vmatmul.msk.f32.vlgmr.msra.gmra.mxu1 %vm1358_vm6, %v2079_v63  ;;  %2679 = vmatmul.msk.f32.vlgmr.msra.gmra.mxu0 %vm1358_vm6, %v2079_v63 }
 0x7d8   : > { %2680 = vmatmul.msk.f32.vlgmr.msra.gmra.mxu2 %vm1358_vm6, %v2079_v63 }
 0x854   : > { %v2101_v0 = vpop.f32.mrf.mxu1  ;;  %v2121_v1 = vpop.f32.mrf.mxu0 }
 0x855   : > { %v2102_v2 = vadd.f32 %v2101_v0, %v4006_v22  ;;  %v2122_v3 = vadd.f32 %v2121_v1, %v4001_v17  ;;  %v2222_v17 = vld [vmem:[#allocation24 + $0x10] sm:$0xff] }
 0x856   : > { %2239 = vmatpush.msrb.mxu0 %v2222_v17 }
 0x857   : > { %v2145_v5 = vadd.f32 %v2144_v4, %v2102_v2  ;;  %v2152_v9 = vadd.f32 %v2151_v7, %v2122_v3 }
 0x858   : > { %2240 = vmatpush.msrb.mxu0 %v2221_v60 }
 0x859   : > { %v2146_v10 = vsub.f32 0.0, %v2145_v5  ;;  %v2153_v11 = vsub.f32 0.0, %v2152_v9 }
 0x85a   : > { %2241 = vmatpush.msrb.mxu0 %v2220_v37 }
 0x85b   : > { %v2147_v12 = vmul.f32 1.442695, %v2146_v10  ;;  %v2154_v13 = vmul.f32 1.442695, %v2153_v11  ;;  %v2141_v19 = vpop.f32.mrf.mxu2 }
 0x85c   : > { %v2142_v21 = vadd.f32 %v2141_v19, %v4010_v35  ;;  %v1380_v35 = vadd.f32 %v2892_v33, %v3998_v15  ;;  %v2257_v15 = vld [vmem:[%s4232_s28 + $0x18] sm:$0xf] }
 0x85d   : > { %2970 = vpow2.f32 %v2147_v12  ;;  %2685 = vmatpush.msk.msrb.mxu2 %vm1239_vm3, %v2257_v15 }
 0x85e   : > { %2972 = vpow2.f32 %v2154_v13 }
 0x85f   : > { %2281 = vmatpush.msrb.mxu2 %v2256_v51 }
 0x861   : > { %2282 = vmatpush.msrb.mxu2 %v2255_v52 }
 0x863   : > { %v2971_v58 = vpop.eup %2970  ;;  %2283 = vmatpush.msrb.mxu2 %v2254_v39 }
 0x864   : > { %v2149_v22 = vadd.f32 1.0, %v2971_v58  ;;  %v2973_v18 = vpop.eup %2972 }
 0x865   : > { %v2156_v20 = vadd.f32 1.0, %v2973_v18 }
 0x866   : > { %2974 = vrcp.f32 %v2149_v22 }
 0x867   : > { %2976 = vrcp.f32 %v2156_v20 }
 0x86c   : > { %v2975_v23 = vpop.eup %2974 }
 0x86d   : > { %v2159_v24 = vmul.f32 %v2975_v23, %v2142_v21  ;;  %v2977_v27 = vpop.eup %2976 }
 0x86e   : > { %v2162_v28 = vsub.f32 1.0, %v2977_v27  ;;  %v2164_v30 = vmul.f32 %v2977_v27, %v2079_v63 }
 0x86f   : > { %v2160_v26 = vadd.f32 %v2159_v24, %v2158_v25 }
 0x871   : > { %2978 = vtanh.f32 %v2160_v26 }
 0x877   : > { %v2979_v29 = vpop.eup %2978 }
 0x878   : > { %v2163_v31 = vmul.f32 %v2979_v29, %v2162_v28 }
 0x87a   : > { %v2165_v32 = vadd.f32 %v2164_v30, %v2163_v31 }
 0x87c   : > { %2166 = vst.msk [vmem:[#allocation5 + $0x7] sm:$0x1] %vm1563_vm8, %v2165_v32 }
 0x883   : > { %v2167_v34 = vld [vmem:[#allocation5] sm:$0xff] }
 0x884   : > { %v2169_v36 = vadd.f32 %v2167_v34, %v1380_v35  ;;  %2168 = vst.msk [vmem:[%s1119_s25] sm:$0xff] %vm1358_vm6, %v2167_v34 }
 0x886   : > { %2681 = vmatmul.msk.f32.vlgmr.msra.gmra.mxu3 %vm1358_vm6, %v2169_v36  ;;  %2215 = vmatpush.msrb.mxu1 %v2169_v36 }
 0x887   : > { %2682 = vmatmul.msk.f32.vlgmr.msrb.gmra.mxu1 %vm1169_vm1, %v3896_v6 }
 0x888   : > { %2688 = vmatpush.msk.msra.mxu1 %vm1239_vm3, %v2311_v40 }
 0x88a   : > { %2331 = vmatpush.msra.mxu1 %v2310_v41 }
 0x88c   : > { %2332 = vmatpush.msra.mxu1 %v2309_v53 }
 0x88e   : > { %2333 = vmatpush.msra.mxu1 %v2308_v61 }
 0x904   : > { %v2217_v38 = vpop.f32.mrf.mxu1 }
 0x905   : > { %2683 = vmatmul.msk.f32.vlgmr.msrb.gmra.mxu0 %vm1358_vm6, %v2217_v38 }
 0x909   : > { %v2197_v54 = vpop.f32.mrf.mxu3 }
 0x90a   : > { %v2198_v43 = vadd.f32 %v2894_v42, %v2197_v54 }
 0x982   : > { %v2243_v55 = vpop.f32.mrf.mxu0 }
 0x983   : > { %v2246_v44 = vadd.f32 %v2243_v55, %v2198_v43 }
 0x985   : > { %v2248_v56 = vmin.f32 %v2246_v44, 0.0  ;;  %vm2247_vm9 = vcmp.gt.f32.partialorder %v2246_v44, 0.0 }
 0x987   : > { %v2249_v45 = vmul.f32 1.442695, %v2248_v56 }
 0x989   : > { %2980 = vpow2.f32 %v2249_v45 }
 0x98f   : > { %v2981_v47 = vpop.eup %2980 }
 0x990   : > { %v2684_v48 = vadd.f32 -1.0, %v2981_v47 }
 0x992   : > { %v2252_v50 = vsel %vm2247_vm9, %v2246_v44, %v2684_v48 }
 0x993   : > { %v2253_v59 = vadd.f32 %v2252_v50, %v1261_v49 }
 0x995   : > { %2686 = vmatmul.msk.f32.vlgmr.msrb.gmra.mxu2 %vm1235_vm4, %v2253_v59  ;;  %2303 = vmatpush.msrb.mxu3 %v2253_v59 }
 0x996   : > { %2687 = vmatmul.msk.f32.vlgmr.msrb.gmra.mxu3 %vm1169_vm1, %v3896_v6 }
 0xa19   : > { %v2305_v62 = vpop.f32.mrf.mxu3 }
 0xa1a   : > { %2689 = vmatmul.msk.f32.vlgmr.msra.gmra.mxu1 %vm1235_vm4, %v2305_v62 }
 0xa1b   : > { %3373 = shalt.err (!%p3370_p11)
}
 0xa1c   : > { %s4234_s0 = sld [smem:[#allocation52_spill]]  ;;  %v2285_v8 = vpop.f32.mrf.mxu2  ;;  %s4236_s5 = sshll.u32 %s3889_s23, 3 }
 0xa1d   : > { %2742 = dma.vmem_to_hbm [thread:$0]  (%p3681_p5), %s2380_s9, 128, %s2382_s2, %s2364_s1  }
 0xa1e   : > { %s4235_s22 = sld [smem:[#allocation53_spill]] }
 0xa22   : > { %v2895_v6 = vld [vmem:[%s4234_s0] ss:$0 sm:$0xff] }
 0xa23   : > { %v2286_v63 = vadd.f32 %v2895_v6, %v2285_v8 }
 0xa24   : > { %s1127_s3 = scalar_lea.vmem %s4235_s22, %s4236_s5 }
 0xa97   : > { %v2335_v0 = vpop.f32.mrf.mxu1 }
 0xa98   : > { %v2338_v1 = vadd.f32 %v2335_v0, %v2286_v63 }
 0xa9a   : > { %v2339_v2 = vsub.f32 0.0, %v2338_v1 }
 0xa9c   : > { %v2340_v3 = vmul.f32 1.442695, %v2339_v2 }
 0xa9e   : > { %2982 = vpow2.f32 %v2340_v3 }
 0xaa4   : > { %v2983_v4 = vpop.eup %2982 }
 0xaa5   : > { %v2342_v7 = vadd.f32 1.0, %v2983_v4 }
 0xaa7   : > { %2984 = vrcp.f32 %v2342_v7  ;;  %v2354_v11 = vand.u32 2147483648, %v2342_v7  ;;  %v2352_v13 = vand.u32 2147483647, %v2342_v7  ;;  %vm2348_vm11 = vweird.f32 %v2342_v7 }
 0xaa9   : > { %v2355_v16 = vor.u32 1.1754944e-38, %v2354_v11  ;;  %vm2353_vm13 = vcmp.eq.f32.partialorder %v2352_v13, 8.507059e+37 }
 0xaad   : > { %v2985_v5 = vpop.eup %2984 }
 0xaae   : > { %v2344_v9 = vmul.f32 %v2985_v5, %v2342_v7  ;;  %vm2349_vm10 = vweird.f32 %v2985_v5 }
 0xaaf   : > { %vm2350_vm12 = vmor %vm2348_vm11, %vm2349_vm10 }
 0xab0   : > { %v2345_v10 = vsub.f32 1.0, %v2344_v9 }
 0xab2   : > { %v2346_v12 = vmul.f32 %v2985_v5, %v2345_v10 }
 0xab4   : > { %v2347_v14 = vadd.f32 %v2985_v5, %v2346_v12 }
 0xab6   : > { %v2351_v57 = vsel %vm2350_vm12, %v2985_v5, %v2347_v14 }
 0xab7   : > { %v2356_v58 = vsel %vm2353_vm13, %v2355_v16, %v2351_v57 }
 0xab8   : > { %2358 = vst.msk [vmem:[%s1127_s3] sm:$0xff] %vm1137_vm2, %v2356_v58 }
 0xab9 PF: > { %s4237_s7 = sld [smem:[#allocation56_spill]] }
 0xaba   : > { %s4238_s2 = sld [smem:[#allocation54_spill]] }
 0xabf   : > { %p2809_p5 = scmp.ge.s32.totalorder %s4237_s7, 2 }
 0xac0   : > { %s2400_s1 = sand.u32 1, %s4238_s2  }
 0xac1   : > { %p2782_p13 = pnand %p2809_p5, %p3685_p6  ;;  %s2401_s15 = scalar_lea.sflag [#allocation8], %s2400_s1 }
 0xac3   : > { %p2783_p1 = pneg %p2782_p13 }
 0xac5   : > { %3419 = dma.done.wait (%p2783_p1), %s2401_s15, 128  }
 0xac6   : > { %3421 = vsyncadd (%p2783_p1), %s2401_s15, 4294967168  ;;  %s4240_s22 = sld [smem:[#allocation57_spill]]  ;;  %s4243_s15 = smov %s3428_s16 }
 0xac7   : > { %s4241_s23 = sld [smem:[#allocation55_spill]] }
 0xac8   : > { %s4242_s18 = sld [smem:[#allocation58_spill]] }
 0xacc   : > { %p79_p3 = scmp.ge.s32.totalorder %s4240_s22, 4  }
 0xacd   : > { %s4244_s16 = smov %s4241_s23 }
 0xace   :  { %81 = sbr.rel (!%p79_p3) target bundleno = 70 (0x46), region = 262 }
 0xad3   :  { %2407 = vsyncpa [#allocation7], 1 }
 0xad4   :  { %2409 = vsyncpa [#allocation7 + $0x1], 1 }
 0xad5   :  { %2410 = vsyncpa [#allocation10], 1 }
 0xad6   :  { %2411 = vsyncpa [#allocation13], 1 }
 0xad7   :  { %2412 = vsyncpa [#allocation16], 1 }
 0xad8   :  { %2413 = vsyncpa [#allocation19], 1 }
 0xad9   :  { %2414 = vsyncpa [#allocation22], 1 }
 0xada   :  { %2415 = vsyncpa [#allocation25], 1 }
 0xadb   :  { %2416 = vsyncpa [#allocation8], 1 }
 0xadc   :  { %2418 = vsyncpa [#allocation8 + $0x1], 1 }

</bundles_post_ra>
